<compile_context>
chip_gen: v7x
topology: tpu7x:2x2x1
jax: 0.10.0
libtpu: 0.0.40
codegen_flags: <defaults>
</compile_context>

<pallas_src>
import functools

import jax
import jax.numpy as jnp
from jax.experimental import pallas as pl
from jax.experimental.pallas import tpu as pltpu

KERNEL_SIZE = 7
PAD = 3  # padding = 3 for kernel_size = 7 (as in the PyTorch module)


def _round_up(x, m):
    return ((x + m - 1) // m) * m


def _pick_c_tile(C, H, W, itemsize, budget_bytes=8 << 20):
    """Largest divisor of C whose double-buffered input block fits the budget."""
    best = 1
    for d in range(1, min(C, 256) + 1):
        if C % d == 0 and 2 * d * H * W * itemsize <= budget_bytes:
            best = d
    return best


def _spatial_attention_kernel(x_ref, w_ref, o_ref, sum_ref, max_ref, pad_ref, *,
                              H, W, C, c_tile, wp, acc_w):
    # x_ref  : (c_tile, H, W)       VMEM  one channel-tile of one image
    # w_ref  : (2*K*K,)             SMEM  flattened conv weight (OIHW order)
    # o_ref  : (H, W)               VMEM  output block (written on last C step)
    # sum_ref: (H, W) f32           VMEM  running channel sum  (across C steps)
    # max_ref: (H, W) f32           VMEM  running channel max  (across C steps)
    # pad_ref: (2, H+2*PAD, wp) f32 VMEM  zero-halo [avg, max] maps for the conv
    c_idx = pl.program_id(1)
    n_ct = pl.num_programs(1)

    @pl.when(c_idx == 0)
    def _init():
        sum_ref[...] = jnp.zeros(sum_ref.shape, jnp.float32)
        max_ref[...] = jnp.full(max_ref.shape, -jnp.inf, jnp.float32)

    # Single fused pass over this channel tile: each plane is read once and
    # feeds both the running sum and the running max (small static unroll).
    s = jnp.zeros((H, W), jnp.float32)
    m = jnp.full((H, W), -jnp.inf, jnp.float32)
    for i in range(c_tile):
        plane = x_ref[i].astype(jnp.float32)          # (H, W)
        s = s + plane
        m = jnp.maximum(m, plane)
    sum_ref[...] = sum_ref[...] + s
    max_ref[...] = jnp.maximum(max_ref[...], m)

    @pl.when(c_idx == n_ct - 1)
    def _finalize():
        avg = sum_ref[...] * (1.0 / C)                # channel mean
        mx = max_ref[...]                             # channel max

        # Zero ONLY the halo strips: the interior is fully overwritten below,
        # and columns >= W + 2*PAD never reach a kept output column.
        z_rows = jnp.zeros((PAD, wp), jnp.float32)
        z_cols = jnp.zeros((H, PAD), jnp.float32)
        for ch, img in ((0, avg), (1, mx)):
            pad_ref[ch, 0:PAD, :] = z_rows
            pad_ref[ch, PAD + H:2 * PAD + H, :] = z_rows
            pad_ref[ch, PAD:PAD + H, 0:PAD] = z_cols
            pad_ref[ch, PAD:PAD + H, PAD + W:2 * PAD + W] = z_cols
            pad_ref[ch, PAD:PAD + H, PAD:PAD + W] = img

        # 7x7 conv (2 -> 1 channels, no bias): one full-width band load per
        # (channel, ky); the kx shift is a lane rotation on the XLU instead of
        # a lane-misaligned VMEM load per tap.
        acc = jnp.zeros((H, acc_w), jnp.float32)
        for ch in range(2):
            for ky in range(KERNEL_SIZE):
                band = pad_ref[ch, ky:ky + H, :]      # (H, wp)
                for kx in range(KERNEL_SIZE):
                    wgt = w_ref[(ch * KERNEL_SIZE + ky) * KERNEL_SIZE + kx]
                    if kx == 0:
                        shifted = band
                    else:
                        # shifted[:, j] == band[:, j + kx]; wrapped lanes only
                        # land in columns >= W, which are discarded below.
                        shifted = pltpu.roll(band, wp - kx, axis=1)
                    tap = shifted if acc_w == wp else shifted[:, :acc_w]
                    acc = acc + wgt * tap

        out = acc if acc_w == W else acc[:, :W]
        o_ref[...] = jax.nn.sigmoid(out).astype(o_ref.dtype)


def spatial_attention(x, weight):
    """x: (N, C, H, W), weight: (1, 2, K, K) float32 (PyTorch OIHW), no bias."""
    N, C, H, W = x.shape
    assert weight.shape == (1, 2, KERNEL_SIZE, KERNEL_SIZE)
    w_flat = weight.reshape(-1).astype(jnp.float32)   # conv taps -> SMEM scalars

    itemsize = x.dtype.itemsize
    c_tile = _pick_c_tile(C, H, W, itemsize)
    n_ct = C // c_tile
    hp = H + 2 * PAD
    # Round the padded-scratch width up to a full lane tile so the kx shift is
    # a native 128-lane rotation.  Columns >= W + 2*PAD stay untouched; they
    # only ever feed discarded accumulator columns.
    wp = _round_up(W + 2 * PAD, 128)
    acc_w = W if W % 128 == 0 else wp

    kernel = functools.partial(_spatial_attention_kernel, H=H, W=W, C=C,
                               c_tile=c_tile, wp=wp, acc_w=acc_w)

    # Scoped-VMEM budget: double-buffered input/output tiles + scratch.
    vmem_bytes = (2 * c_tile * H * W * itemsize   # input tile, double-buffered
                  + 2 * H * W * itemsize          # output tile, double-buffered
                  + 2 * H * W * 4                 # sum / max accumulators
                  + 2 * hp * wp * 4)              # zero-halo conv scratch
    vmem_limit = int(min(max(2 * vmem_bytes, 32 << 20), 64 << 20))

    return pl.pallas_call(
        kernel,
        out_shape=jax.ShapeDtypeStruct((N, 1, H, W), x.dtype),
        grid=(N, n_ct),
        in_specs=[
            pl.BlockSpec((None, c_tile, H, W), lambda b, c: (b, c, 0, 0)),
            pl.BlockSpec(memory_space=pltpu.MemorySpace.SMEM),
        ],
        out_specs=pl.BlockSpec((None, None, H, W), lambda b, c: (b, 0, 0, 0)),
        scratch_shapes=[
            pltpu.VMEM((H, W), jnp.float32),        # running channel sum
            pltpu.VMEM((H, W), jnp.float32),        # running channel max
            pltpu.VMEM((2, hp, wp), jnp.float32),   # zero-halo [avg, max] maps
        ],
        compiler_params=pltpu.CompilerParams(
            dimension_semantics=("parallel", "arbitrary"),
            vmem_limit_bytes=vmem_limit,
        ),
    )(x, w_flat)


def spatial_attention_reference(x, weight):
    """Pure-JAX reference (mirrors the PyTorch forward)."""
    avg = jnp.mean(x, axis=1, keepdims=True)
    mx = jnp.max(x, axis=1, keepdims=True)
    feat = jnp.concatenate([avg, mx], axis=1)  # (N, 2, H, W)
    out = jax.lax.conv_general_dilated(
        feat, weight, window_strides=(1, 1),
        padding=[(PAD, PAD), (PAD, PAD)],
        dimension_numbers=("NCHW", "OIHW", "NCHW"),
    )
    return jax.nn.sigmoid(out)


if __name__ == "__main__":
    key = jax.random.PRNGKey(0)
    k_x, k_w = jax.random.split(key)

    N, C, H, W = 2, 4, 16, 16
    x = jax.random.normal(k_x, (N, C, H, W), dtype=jnp.float32)
    # Deterministic synthetic conv weight, shape (out=1, in=2, K, K), no bias.
    weight = 0.1 * jax.random.normal(k_w, (1, 2, KERNEL_SIZE, KERNEL_SIZE),
                                     dtype=jnp.float32)

    out = spatial_attention(x, weight)
    out = jax.block_until_ready(out)

    ref = spatial_attention_reference(x, weight)
    assert out.shape == (N, 1, H, W)
    assert jnp.allclose(out, ref, atol=1e-5, rtol=1e-5), "mismatch vs reference"

    print("KERNEL_OK")
</pallas_src>

<mosaic_0001>
module attributes {stable_mosaic.version = 11 : i64} {
  func.func @_spatial_attention_kernel(%arg0: i32, %arg1: i32, %arg2: memref<1x4x16x16xf32, #tpu.memory_space<vmem>>, %arg3: memref<98xf32, #tpu.memory_space<smem>>, %arg4: memref<1x1x16x16xf32, #tpu.memory_space<vmem>>, %arg5: memref<16x16xf32, #tpu.memory_space<vmem>>, %arg6: memref<16x16xf32, #tpu.memory_space<vmem>>, %arg7: memref<2x22x128xf32, #tpu.memory_space<vmem>>) attributes {dimension_semantics = [#tpu.dimension_semantics<parallel>, #tpu.dimension_semantics<arbitrary>], iteration_bounds = array<i64: 2, 1>, scalar_prefetch = 0 : i64, scratch_operands = 3 : i64, tpu.core_type = #tpu.core_type<tc>, window_params = [{transform_indices = @transform_0, window_bounds = array<i64: 1, 4, 16, 16>}, {transform_indices = @transform_1, window_bounds = array<i64: 98>}, {transform_indices = @transform_2, window_bounds = array<i64: 1, 1, 16, 16>}]} {
    %c0_i32 = arith.constant 0 : i32
    %0 = arith.cmpi eq, %arg1, %c0_i32 : i32
    %1 = arith.extui %0 : i1 to i32
    %c0_i32_0 = arith.constant 0 : i32
    %2 = arith.cmpi ne, %1, %c0_i32_0 : i32
    scf.if %2 {
      %cst_24 = arith.constant 0.000000e+00 : f32
      %30 = vector.broadcast %cst_24 : f32 to vector<16x16xf32>
      %c0_25 = arith.constant 0 : index
      %c0_26 = arith.constant 0 : index
      %31 = vector.load %arg5[%c0_25, %c0_26] : memref<16x16xf32, #tpu.memory_space<vmem>>, vector<16x16xf32>
      tpu.vector_store %arg5[%c0_25, %c0_26], %30 {strides = array<i32>} : memref<16x16xf32, #tpu.memory_space<vmem>>, vector<16x16xf32>,
      %cst_27 = arith.constant 0xFF800000 : f32
      %32 = vector.broadcast %cst_27 : f32 to vector<16x16xf32>
      %c0_28 = arith.constant 0 : index
      %c0_29 = arith.constant 0 : index
      %33 = vector.load %arg6[%c0_28, %c0_29] : memref<16x16xf32, #tpu.memory_space<vmem>>, vector<16x16xf32>
      tpu.vector_store %arg6[%c0_28, %c0_29], %32 {strides = array<i32>} : memref<16x16xf32, #tpu.memory_space<vmem>>, vector<16x16xf32>,
    } else {
    }
    %cst = arith.constant 0.000000e+00 : f32
    %3 = vector.broadcast %cst : f32 to vector<16x16xf32>
    %cst_1 = arith.constant 0xFF800000 : f32
    %4 = vector.broadcast %cst_1 : f32 to vector<16x16xf32>
    %c0 = arith.constant 0 : index
    %c0_2 = arith.constant 0 : index
    %c0_3 = arith.constant 0 : index
    %c0_4 = arith.constant 0 : index
    %5 = vector.load %arg2[%c0, %c0_2, %c0_3, %c0_4] : memref<1x4x16x16xf32, #tpu.memory_space<vmem>>, vector<1x1x16x16xf32>
    %6 = vector.shape_cast %5 : vector<1x1x16x16xf32> to vector<16x16xf32>
    %7 = arith.addf %3, %6 : vector<16x16xf32>
    %8 = arith.maximumf %4, %6 : vector<16x16xf32>
    %c0_5 = arith.constant 0 : index
    %c1 = arith.constant 1 : index
    %c0_6 = arith.constant 0 : index
    %c0_7 = arith.constant 0 : index
    %9 = vector.load %arg2[%c0_5, %c1, %c0_6, %c0_7] : memref<1x4x16x16xf32, #tpu.memory_space<vmem>>, vector<1x1x16x16xf32>
    %10 = vector.shape_cast %9 : vector<1x1x16x16xf32> to vector<16x16xf32>
    %11 = arith.addf %7, %10 : vector<16x16xf32>
    %12 = arith.maximumf %8, %10 : vector<16x16xf32>
    %c0_8 = arith.constant 0 : index
    %c2 = arith.constant 2 : index
    %c0_9 = arith.constant 0 : index
    %c0_10 = arith.constant 0 : index
    %13 = vector.load %arg2[%c0_8, %c2, %c0_9, %c0_10] : memref<1x4x16x16xf32, #tpu.memory_space<vmem>>, vector<1x1x16x16xf32>
    %14 = vector.shape_cast %13 : vector<1x1x16x16xf32> to vector<16x16xf32>
    %15 = arith.addf %11, %14 : vector<16x16xf32>
    %16 = arith.maximumf %12, %14 : vector<16x16xf32>
    %c0_11 = arith.constant 0 : index
    %c3 = arith.constant 3 : index
    %c0_12 = arith.constant 0 : index
    %c0_13 = arith.constant 0 : index
    %17 = vector.load %arg2[%c0_11, %c3, %c0_12, %c0_13] : memref<1x4x16x16xf32, #tpu.memory_space<vmem>>, vector<1x1x16x16xf32>
    %18 = vector.shape_cast %17 : vector<1x1x16x16xf32> to vector<16x16xf32>
    %19 = arith.addf %15, %18 : vector<16x16xf32>
    %20 = arith.maximumf %16, %18 : vector<16x16xf32>
    %c0_14 = arith.constant 0 : index
    %c0_15 = arith.constant 0 : index
    %21 = vector.load %arg5[%c0_14, %c0_15] : memref<16x16xf32, #tpu.memory_space<vmem>>, vector<16x16xf32>
    %22 = arith.addf %21, %19 : vector<16x16xf32>
    %c0_16 = arith.constant 0 : index
    %c0_17 = arith.constant 0 : index
    %23 = vector.load %arg5[%c0_16, %c0_17] : memref<16x16xf32, #tpu.memory_space<vmem>>, vector<16x16xf32>
    tpu.vector_store %arg5[%c0_16, %c0_17], %22 {strides = array<i32>} : memref<16x16xf32, #tpu.memory_space<vmem>>, vector<16x16xf32>,
    %c0_18 = arith.constant 0 : index
    %c0_19 = arith.constant 0 : index
    %24 = vector.load %arg6[%c0_18, %c0_19] : memref<16x16xf32, #tpu.memory_space<vmem>>, vector<16x16xf32>
    %25 = arith.maximumf %24, %20 : vector<16x16xf32>
    %c0_20 = arith.constant 0 : index
    %c0_21 = arith.constant 0 : index
    %26 = vector.load %arg6[%c0_20, %c0_21] : memref<16x16xf32, #tpu.memory_space<vmem>>, vector<16x16xf32>
    tpu.vector_store %arg6[%c0_20, %c0_21], %25 {strides = array<i32>} : memref<16x16xf32, #tpu.memory_space<vmem>>, vector<16x16xf32>,
    %c0_i32_22 = arith.constant 0 : i32
    %27 = arith.cmpi eq, %arg1, %c0_i32_22 : i32
    %28 = arith.extui %27 : i1 to i32
    %c0_i32_23 = arith.constant 0 : i32
    %29 = arith.cmpi ne, %28, %c0_i32_23 : i32
    scf.if %29 {
      %c0_24 = arith.constant 0 : index
      %c0_25 = arith.constant 0 : index
      %30 = vector.load %arg5[%c0_24, %c0_25] : memref<16x16xf32, #tpu.memory_space<vmem>>, vector<16x16xf32>
      %cst_26 = arith.constant 2.500000e-01 : f32
      %31 = vector.broadcast %cst_26 : f32 to vector<16x16xf32>
      %32 = arith.mulf %30, %31 : vector<16x16xf32>
      %c0_27 = arith.constant 0 : index
      %c0_28 = arith.constant 0 : index
      %33 = vector.load %arg6[%c0_27, %c0_28] : memref<16x16xf32, #tpu.memory_space<vmem>>, vector<16x16xf32>
      %cst_29 = arith.constant 0.000000e+00 : f32
      %34 = vector.broadcast %cst_29 : f32 to vector<3x128xf32>
      %cst_30 = arith.constant 0.000000e+00 : f32
      %35 = vector.broadcast %cst_30 : f32 to vector<16x3xf32>
      %c0_31 = arith.constant 0 : index
      %c0_32 = arith.constant 0 : index
      %c0_33 = arith.constant 0 : index
      %36 = vector.load %arg7[%c0_31, %c0_32, %c0_33] : memref<2x22x128xf32, #tpu.memory_space<vmem>>, vector<1x3x128xf32>
      %37 = vector.shape_cast %36 : vector<1x3x128xf32> to vector<3x128xf32>
      %38 = vector.shape_cast %34 : vector<3x128xf32> to vector<1x3x128xf32>
      tpu.vector_store %arg7[%c0_31, %c0_32, %c0_33], %38 {strides = array<i32>} : memref<2x22x128xf32, #tpu.memory_space<vmem>>, vector<1x3x128xf32>,
      %c0_34 = arith.constant 0 : index
      %c19 = arith.constant 19 : index
      %c0_35 = arith.constant 0 : index
      %39 = vector.load %arg7[%c0_34, %c19, %c0_35] : memref<2x22x128xf32, #tpu.memory_space<vmem>>, vector<1x3x128xf32>
      %40 = vector.shape_cast %39 : vector<1x3x128xf32> to vector<3x128xf32>
      %41 = vector.shape_cast %34 : vector<3x128xf32> to vector<1x3x128xf32>
      tpu.vector_store %arg7[%c0_34, %c19, %c0_35], %41 {strides = array<i32>} : memref<2x22x128xf32, #tpu.memory_space<vmem>>, vector<1x3x128xf32>,
      %c0_36 = arith.constant 0 : index
      %c3_37 = arith.constant 3 : index
      %c0_38 = arith.constant 0 : index
      %42 = vector.load %arg7[%c0_36, %c3_37, %c0_38] : memref<2x22x128xf32, #tpu.memory_space<vmem>>, vector<1x16x3xf32>
      %43 = vector.shape_cast %42 : vector<1x16x3xf32> to vector<16x3xf32>
      %44 = vector.shape_cast %35 : vector<16x3xf32> to vector<1x16x3xf32>
      tpu.vector_store %arg7[%c0_36, %c3_37, %c0_38], %44 {strides = array<i32>} : memref<2x22x128xf32, #tpu.memory_space<vmem>>, vector<1x16x3xf32>,
      %c0_39 = arith.constant 0 : index
      %c3_40 = arith.constant 3 : index
      %c19_41 = arith.constant 19 : index
      %45 = vector.load %arg7[%c0_39, %c3_40, %c19_41] : memref<2x22x128xf32, #tpu.memory_space<vmem>>, vector<1x16x3xf32>
      %46 = vector.shape_cast %45 : vector<1x16x3xf32> to vector<16x3xf32>
      %47 = vector.shape_cast %35 : vector<16x3xf32> to vector<1x16x3xf32>
      tpu.vector_store %arg7[%c0_39, %c3_40, %c19_41], %47 {strides = array<i32>} : memref<2x22x128xf32, #tpu.memory_space<vmem>>, vector<1x16x3xf32>,
      %c0_42 = arith.constant 0 : index
      %c3_43 = arith.constant 3 : index
      %c3_44 = arith.constant 3 : index
      %48 = vector.load %arg7[%c0_42, %c3_43, %c3_44] : memref<2x22x128xf32, #tpu.memory_space<vmem>>, vector<1x16x16xf32>
      %49 = vector.shape_cast %48 : vector<1x16x16xf32> to vector<16x16xf32>
      %50 = vector.shape_cast %32 : vector<16x16xf32> to vector<1x16x16xf32>
      tpu.vector_store %arg7[%c0_42, %c3_43, %c3_44], %50 {strides = array<i32>} : memref<2x22x128xf32, #tpu.memory_space<vmem>>, vector<1x16x16xf32>,
      %c1_45 = arith.constant 1 : index
      %c0_46 = arith.constant 0 : index
      %c0_47 = arith.constant 0 : index
      %51 = vector.load %arg7[%c1_45, %c0_46, %c0_47] : memref<2x22x128xf32, #tpu.memory_space<vmem>>, vector<1x3x128xf32>
      %52 = vector.shape_cast %51 : vector<1x3x128xf32> to vector<3x128xf32>
      %53 = vector.shape_cast %34 : vector<3x128xf32> to vector<1x3x128xf32>
      tpu.vector_store %arg7[%c1_45, %c0_46, %c0_47], %53 {strides = array<i32>} : memref<2x22x128xf32, #tpu.memory_space<vmem>>, vector<1x3x128xf32>,
      %c1_48 = arith.constant 1 : index
      %c19_49 = arith.constant 19 : index
      %c0_50 = arith.constant 0 : index
      %54 = vector.load %arg7[%c1_48, %c19_49, %c0_50] : memref<2x22x128xf32, #tpu.memory_space<vmem>>, vector<1x3x128xf32>
      %55 = vector.shape_cast %54 : vector<1x3x128xf32> to vector<3x128xf32>
      %56 = vector.shape_cast %34 : vector<3x128xf32> to vector<1x3x128xf32>
      tpu.vector_store %arg7[%c1_48, %c19_49, %c0_50], %56 {strides = array<i32>} : memref<2x22x128xf32, #tpu.memory_space<vmem>>, vector<1x3x128xf32>,
      %c1_51 = arith.constant 1 : index
      %c3_52 = arith.constant 3 : index
      %c0_53 = arith.constant 0 : index
      %57 = vector.load %arg7[%c1_51, %c3_52, %c0_53] : memref<2x22x128xf32, #tpu.memory_space<vmem>>, vector<1x16x3xf32>
      %58 = vector.shape_cast %57 : vector<1x16x3xf32> to vector<16x3xf32>
      %59 = vector.shape_cast %35 : vector<16x3xf32> to vector<1x16x3xf32>
      tpu.vector_store %arg7[%c1_51, %c3_52, %c0_53], %59 {strides = array<i32>} : memref<2x22x128xf32, #tpu.memory_space<vmem>>, vector<1x16x3xf32>,
      %c1_54 = arith.constant 1 : index
      %c3_55 = arith.constant 3 : index
      %c19_56 = arith.constant 19 : index
      %60 = vector.load %arg7[%c1_54, %c3_55, %c19_56] : memref<2x22x128xf32, #tpu.memory_space<vmem>>, vector<1x16x3xf32>
      %61 = vector.shape_cast %60 : vector<1x16x3xf32> to vector<16x3xf32>
      %62 = vector.shape_cast %35 : vector<16x3xf32> to vector<1x16x3xf32>
      tpu.vector_store %arg7[%c1_54, %c3_55, %c19_56], %62 {strides = array<i32>} : memref<2x22x128xf32, #tpu.memory_space<vmem>>, vector<1x16x3xf32>,
      %c1_57 = arith.constant 1 : index
      %c3_58 = arith.constant 3 : index
      %c3_59 = arith.constant 3 : index
      %63 = vector.load %arg7[%c1_57, %c3_58, %c3_59] : memref<2x22x128xf32, #tpu.memory_space<vmem>>, vector<1x16x16xf32>
      %64 = vector.shape_cast %63 : vector<1x16x16xf32> to vector<16x16xf32>
      %65 = vector.shape_cast %33 : vector<16x16xf32> to vector<1x16x16xf32>
      tpu.vector_store %arg7[%c1_57, %c3_58, %c3_59], %65 {strides = array<i32>} : memref<2x22x128xf32, #tpu.memory_space<vmem>>, vector<1x16x16xf32>,
      %cst_60 = arith.constant 0.000000e+00 : f32
      %66 = vector.broadcast %cst_60 : f32 to vector<16x128xf32>
      %c0_61 = arith.constant 0 : index
      %c0_62 = arith.constant 0 : index
      %c0_63 = arith.constant 0 : index
      %67 = vector.load %arg7[%c0_61, %c0_62, %c0_63] : memref<2x22x128xf32, #tpu.memory_space<vmem>>, vector<1x16x128xf32>
      %68 = vector.shape_cast %67 : vector<1x16x128xf32> to vector<16x128xf32>
      %c0_64 = arith.constant 0 : index
      %69 = memref.load %arg3[%c0_64] : memref<98xf32, #tpu.memory_space<smem>>
      %70 = vector.broadcast %69 : f32 to vector<16x128xf32>
      %71 = arith.mulf %70, %68 : vector<16x128xf32>
      %72 = arith.addf %66, %71 : vector<16x128xf32>
      %c1_65 = arith.constant 1 : index
      %73 = memref.load %arg3[%c1_65] : memref<98xf32, #tpu.memory_space<smem>>
      %c127_i32 = arith.constant 127 : i32
      %74 = tpu.dynamic_rotate %68 by %c127_i32 dim 1 : vector<16x128xf32>, i32 -> vector<16x128xf32>
      %75 = vector.broadcast %73 : f32 to vector<16x128xf32>
      %76 = arith.mulf %75, %74 : vector<16x128xf32>
      %77 = arith.addf %72, %76 : vector<16x128xf32>
      %c2_66 = arith.constant 2 : index
      %78 = memref.load %arg3[%c2_66] : memref<98xf32, #tpu.memory_space<smem>>
      %c126_i32 = arith.constant 126 : i32
      %79 = tpu.dynamic_rotate %68 by %c126_i32 dim 1 : vector<16x128xf32>, i32 -> vector<16x128xf32>
      %80 = vector.broadcast %78 : f32 to vector<16x128xf32>
      %81 = arith.mulf %80, %79 : vector<16x128xf32>
      %82 = arith.addf %77, %81 : vector<16x128xf32>
      %c3_67 = arith.constant 3 : index
      %83 = memref.load %arg3[%c3_67] : memref<98xf32, #tpu.memory_space<smem>>
      %c125_i32 = arith.constant 125 : i32
      %84 = tpu.dynamic_rotate %68 by %c125_i32 dim 1 : vector<16x128xf32>, i32 -> vector<16x128xf32>
      %85 = vector.broadcast %83 : f32 to vector<16x128xf32>
      %86 = arith.mulf %85, %84 : vector<16x128xf32>
      %87 = arith.addf %82, %86 : vector<16x128xf32>
      %c4 = arith.constant 4 : index
      %88 = memref.load %arg3[%c4] : memref<98xf32, #tpu.memory_space<smem>>
      %c124_i32 = arith.constant 124 : i32
      %89 = tpu.dynamic_rotate %68 by %c124_i32 dim 1 : vector<16x128xf32>, i32 -> vector<16x128xf32>
      %90 = vector.broadcast %88 : f32 to vector<16x128xf32>
      %91 = arith.mulf %90, %89 : vector<16x128xf32>
      %92 = arith.addf %87, %91 : vector<16x128xf32>
      %c5 = arith.constant 5 : index
      %93 = memref.load %arg3[%c5] : memref<98xf32, #tpu.memory_space<smem>>
      %c123_i32 = arith.constant 123 : i32
      %94 = tpu.dynamic_rotate %68 by %c123_i32 dim 1 : vector<16x128xf32>, i32 -> vector<16x128xf32>
      %95 = vector.broadcast %93 : f32 to vector<16x128xf32>
      %96 = arith.mulf %95, %94 : vector<16x128xf32>
      %97 = arith.addf %92, %96 : vector<16x128xf32>
      %c6 = arith.constant 6 : index
      %98 = memref.load %arg3[%c6] : memref<98xf32, #tpu.memory_space<smem>>
      %c122_i32 = arith.constant 122 : i32
      %99 = tpu.dynamic_rotate %68 by %c122_i32 dim 1 : vector<16x128xf32>, i32 -> vector<16x128xf32>
      %100 = vector.broadcast %98 : f32 to vector<16x128xf32>
      %101 = arith.mulf %100, %99 : vector<16x128xf32>
      %102 = arith.addf %97, %101 : vector<16x128xf32>
      %c0_68 = arith.constant 0 : index
      %c1_69 = arith.constant 1 : index
      %c0_70 = arith.constant 0 : index
      %103 = vector.load %arg7[%c0_68, %c1_69, %c0_70] : memref<2x22x128xf32, #tpu.memory_space<vmem>>, vector<1x16x128xf32>
      %104 = vector.shape_cast %103 : vector<1x16x128xf32> to vector<16x128xf32>
      %c7 = arith.constant 7 : index
      %105 = memref.load %arg3[%c7] : memref<98xf32, #tpu.memory_space<smem>>
      %106 = vector.broadcast %105 : f32 to vector<16x128xf32>
      %107 = arith.mulf %106, %104 : vector<16x128xf32>
      %108 = arith.addf %102, %107 : vector<16x128xf32>
      %c8 = arith.constant 8 : index
      %109 = memref.load %arg3[%c8] : memref<98xf32, #tpu.memory_space<smem>>
      %c127_i32_71 = arith.constant 127 : i32
      %110 = tpu.dynamic_rotate %104 by %c127_i32_71 dim 1 : vector<16x128xf32>, i32 -> vector<16x128xf32>
      %111 = vector.broadcast %109 : f32 to vector<16x128xf32>
      %112 = arith.mulf %111, %110 : vector<16x128xf32>
      %113 = arith.addf %108, %112 : vector<16x128xf32>
      %c9 = arith.constant 9 : index
      %114 = memref.load %arg3[%c9] : memref<98xf32, #tpu.memory_space<smem>>
      %c126_i32_72 = arith.constant 126 : i32
      %115 = tpu.dynamic_rotate %104 by %c126_i32_72 dim 1 : vector<16x128xf32>, i32 -> vector<16x128xf32>
      %116 = vector.broadcast %114 : f32 to vector<16x128xf32>
      %117 = arith.mulf %116, %115 : vector<16x128xf32>
      %118 = arith.addf %113, %117 : vector<16x128xf32>
      %c10 = arith.constant 10 : index
      %119 = memref.load %arg3[%c10] : memref<98xf32, #tpu.memory_space<smem>>
      %c125_i32_73 = arith.constant 125 : i32
      %120 = tpu.dynamic_rotate %104 by %c125_i32_73 dim 1 : vector<16x128xf32>, i32 -> vector<16x128xf32>
      %121 = vector.broadcast %119 : f32 to vector<16x128xf32>
      %122 = arith.mulf %121, %120 : vector<16x128xf32>
      %123 = arith.addf %118, %122 : vector<16x128xf32>
      %c11 = arith.constant 11 : index
      %124 = memref.load %arg3[%c11] : memref<98xf32, #tpu.memory_space<smem>>
      %c124_i32_74 = arith.constant 124 : i32
      %125 = tpu.dynamic_rotate %104 by %c124_i32_74 dim 1 : vector<16x128xf32>, i32 -> vector<16x128xf32>
      %126 = vector.broadcast %124 : f32 to vector<16x128xf32>
      %127 = arith.mulf %126, %125 : vector<16x128xf32>
      %128 = arith.addf %123, %127 : vector<16x128xf32>
      %c12 = arith.constant 12 : index
      %129 = memref.load %arg3[%c12] : memref<98xf32, #tpu.memory_space<smem>>
      %c123_i32_75 = arith.constant 123 : i32
      %130 = tpu.dynamic_rotate %104 by %c123_i32_75 dim 1 : vector<16x128xf32>, i32 -> vector<16x128xf32>
      %131 = vector.broadcast %129 : f32 to vector<16x128xf32>
      %132 = arith.mulf %131, %130 : vector<16x128xf32>
      %133 = arith.addf %128, %132 : vector<16x128xf32>
      %c13 = arith.constant 13 : index
      %134 = memref.load %arg3[%c13] : memref<98xf32, #tpu.memory_space<smem>>
      %c122_i32_76 = arith.constant 122 : i32
      %135 = tpu.dynamic_rotate %104 by %c122_i32_76 dim 1 : vector<16x128xf32>, i32 -> vector<16x128xf32>
      %136 = vector.broadcast %134 : f32 to vector<16x128xf32>
      %137 = arith.mulf %136, %135 : vector<16x128xf32>
      %138 = arith.addf %133, %137 : vector<16x128xf32>
      %c0_77 = arith.constant 0 : index
      %c2_78 = arith.constant 2 : index
      %c0_79 = arith.constant 0 : index
      %139 = vector.load %arg7[%c0_77, %c2_78, %c0_79] : memref<2x22x128xf32, #tpu.memory_space<vmem>>, vector<1x16x128xf32>
      %140 = vector.shape_cast %139 : vector<1x16x128xf32> to vector<16x128xf32>
      %c14 = arith.constant 14 : index
      %141 = memref.load %arg3[%c14] : memref<98xf32, #tpu.memory_space<smem>>
      %142 = vector.broadcast %141 : f32 to vector<16x128xf32>
      %143 = arith.mulf %142, %140 : vector<16x128xf32>
      %144 = arith.addf %138, %143 : vector<16x128xf32>
      %c15 = arith.constant 15 : index
      %145 = memref.load %arg3[%c15] : memref<98xf32, #tpu.memory_space<smem>>
      %c127_i32_80 = arith.constant 127 : i32
      %146 = tpu.dynamic_rotate %140 by %c127_i32_80 dim 1 : vector<16x128xf32>, i32 -> vector<16x128xf32>
      %147 = vector.broadcast %145 : f32 to vector<16x128xf32>
      %148 = arith.mulf %147, %146 : vector<16x128xf32>
      %149 = arith.addf %144, %148 : vector<16x128xf32>
      %c16 = arith.constant 16 : index
      %150 = memref.load %arg3[%c16] : memref<98xf32, #tpu.memory_space<smem>>
      %c126_i32_81 = arith.constant 126 : i32
      %151 = tpu.dynamic_rotate %140 by %c126_i32_81 dim 1 : vector<16x128xf32>, i32 -> vector<16x128xf32>
      %152 = vector.broadcast %150 : f32 to vector<16x128xf32>
      %153 = arith.mulf %152, %151 : vector<16x128xf32>
      %154 = arith.addf %149, %153 : vector<16x128xf32>
      %c17 = arith.constant 17 : index
      %155 = memref.load %arg3[%c17] : memref<98xf32, #tpu.memory_space<smem>>
      %c125_i32_82 = arith.constant 125 : i32
      %156 = tpu.dynamic_rotate %140 by %c125_i32_82 dim 1 : vector<16x128xf32>, i32 -> vector<16x128xf32>
      %157 = vector.broadcast %155 : f32 to vector<16x128xf32>
      %158 = arith.mulf %157, %156 : vector<16x128xf32>
      %159 = arith.addf %154, %158 : vector<16x128xf32>
      %c18 = arith.constant 18 : index
      %160 = memref.load %arg3[%c18] : memref<98xf32, #tpu.memory_space<smem>>
      %c124_i32_83 = arith.constant 124 : i32
      %161 = tpu.dynamic_rotate %140 by %c124_i32_83 dim 1 : vector<16x128xf32>, i32 -> vector<16x128xf32>
      %162 = vector.broadcast %160 : f32 to vector<16x128xf32>
      %163 = arith.mulf %162, %161 : vector<16x128xf32>
      %164 = arith.addf %159, %163 : vector<16x128xf32>
      %c19_84 = arith.constant 19 : index
      %165 = memref.load %arg3[%c19_84] : memref<98xf32, #tpu.memory_space<smem>>
      %c123_i32_85 = arith.constant 123 : i32
      %166 = tpu.dynamic_rotate %140 by %c123_i32_85 dim 1 : vector<16x128xf32>, i32 -> vector<16x128xf32>
      %167 = vector.broadcast %165 : f32 to vector<16x128xf32>
      %168 = arith.mulf %167, %166 : vector<16x128xf32>
      %169 = arith.addf %164, %168 : vector<16x128xf32>
      %c20 = arith.constant 20 : index
      %170 = memref.load %arg3[%c20] : memref<98xf32, #tpu.memory_space<smem>>
      %c122_i32_86 = arith.constant 122 : i32
      %171 = tpu.dynamic_rotate %140 by %c122_i32_86 dim 1 : vector<16x128xf32>, i32 -> vector<16x128xf32>
      %172 = vector.broadcast %170 : f32 to vector<16x128xf32>
      %173 = arith.mulf %172, %171 : vector<16x128xf32>
      %174 = arith.addf %169, %173 : vector<16x128xf32>
      %c0_87 = arith.constant 0 : index
      %c3_88 = arith.constant 3 : index
      %c0_89 = arith.constant 0 : index
      %175 = vector.load %arg7[%c0_87, %c3_88, %c0_89] : memref<2x22x128xf32, #tpu.memory_space<vmem>>, vector<1x16x128xf32>
      %176 = vector.shape_cast %175 : vector<1x16x128xf32> to vector<16x128xf32>
      %c21 = arith.constant 21 : index
      %177 = memref.load %arg3[%c21] : memref<98xf32, #tpu.memory_space<smem>>
      %178 = vector.broadcast %177 : f32 to vector<16x128xf32>
      %179 = arith.mulf %178, %176 : vector<16x128xf32>
      %180 = arith.addf %174, %179 : vector<16x128xf32>
      %c22 = arith.constant 22 : index
      %181 = memref.load %arg3[%c22] : memref<98xf32, #tpu.memory_space<smem>>
      %c127_i32_90 = arith.constant 127 : i32
      %182 = tpu.dynamic_rotate %176 by %c127_i32_90 dim 1 : vector<16x128xf32>, i32 -> vector<16x128xf32>
      %183 = vector.broadcast %181 : f32 to vector<16x128xf32>
      %184 = arith.mulf %183, %182 : vector<16x128xf32>
      %185 = arith.addf %180, %184 : vector<16x128xf32>
      %c23 = arith.constant 23 : index
      %186 = memref.load %arg3[%c23] : memref<98xf32, #tpu.memory_space<smem>>
      %c126_i32_91 = arith.constant 126 : i32
      %187 = tpu.dynamic_rotate %176 by %c126_i32_91 dim 1 : vector<16x128xf32>, i32 -> vector<16x128xf32>
      %188 = vector.broadcast %186 : f32 to vector<16x128xf32>
      %189 = arith.mulf %188, %187 : vector<16x128xf32>
      %190 = arith.addf %185, %189 : vector<16x128xf32>
      %c24 = arith.constant 24 : index
      %191 = memref.load %arg3[%c24] : memref<98xf32, #tpu.memory_space<smem>>
      %c125_i32_92 = arith.constant 125 : i32
      %192 = tpu.dynamic_rotate %176 by %c125_i32_92 dim 1 : vector<16x128xf32>, i32 -> vector<16x128xf32>
      %193 = vector.broadcast %191 : f32 to vector<16x128xf32>
      %194 = arith.mulf %193, %192 : vector<16x128xf32>
      %195 = arith.addf %190, %194 : vector<16x128xf32>
      %c25 = arith.constant 25 : index
      %196 = memref.load %arg3[%c25] : memref<98xf32, #tpu.memory_space<smem>>
      %c124_i32_93 = arith.constant 124 : i32
      %197 = tpu.dynamic_rotate %176 by %c124_i32_93 dim 1 : vector<16x128xf32>, i32 -> vector<16x128xf32>
      %198 = vector.broadcast %196 : f32 to vector<16x128xf32>
      %199 = arith.mulf %198, %197 : vector<16x128xf32>
      %200 = arith.addf %195, %199 : vector<16x128xf32>
      %c26 = arith.constant 26 : index
      %201 = memref.load %arg3[%c26] : memref<98xf32, #tpu.memory_space<smem>>
      %c123_i32_94 = arith.constant 123 : i32
      %202 = tpu.dynamic_rotate %176 by %c123_i32_94 dim 1 : vector<16x128xf32>, i32 -> vector<16x128xf32>
      %203 = vector.broadcast %201 : f32 to vector<16x128xf32>
      %204 = arith.mulf %203, %202 : vector<16x128xf32>
      %205 = arith.addf %200, %204 : vector<16x128xf32>
      %c27 = arith.constant 27 : index
      %206 = memref.load %arg3[%c27] : memref<98xf32, #tpu.memory_space<smem>>
      %c122_i32_95 = arith.constant 122 : i32
      %207 = tpu.dynamic_rotate %176 by %c122_i32_95 dim 1 : vector<16x128xf32>, i32 -> vector<16x128xf32>
      %208 = vector.broadcast %206 : f32 to vector<16x128xf32>
      %209 = arith.mulf %208, %207 : vector<16x128xf32>
      %210 = arith.addf %205, %209 : vector<16x128xf32>
      %c0_96 = arith.constant 0 : index
      %c4_97 = arith.constant 4 : index
      %c0_98 = arith.constant 0 : index
      %211 = vector.load %arg7[%c0_96, %c4_97, %c0_98] : memref<2x22x128xf32, #tpu.memory_space<vmem>>, vector<1x16x128xf32>
      %212 = vector.shape_cast %211 : vector<1x16x128xf32> to vector<16x128xf32>
      %c28 = arith.constant 28 : index
      %213 = memref.load %arg3[%c28] : memref<98xf32, #tpu.memory_space<smem>>
      %214 = vector.broadcast %213 : f32 to vector<16x128xf32>
      %215 = arith.mulf %214, %212 : vector<16x128xf32>
      %216 = arith.addf %210, %215 : vector<16x128xf32>
      %c29 = arith.constant 29 : index
      %217 = memref.load %arg3[%c29] : memref<98xf32, #tpu.memory_space<smem>>
      %c127_i32_99 = arith.constant 127 : i32
      %218 = tpu.dynamic_rotate %212 by %c127_i32_99 dim 1 : vector<16x128xf32>, i32 -> vector<16x128xf32>
      %219 = vector.broadcast %217 : f32 to vector<16x128xf32>
      %220 = arith.mulf %219, %218 : vector<16x128xf32>
      %221 = arith.addf %216, %220 : vector<16x128xf32>
      %c30 = arith.constant 30 : index
      %222 = memref.load %arg3[%c30] : memref<98xf32, #tpu.memory_space<smem>>
      %c126_i32_100 = arith.constant 126 : i32
      %223 = tpu.dynamic_rotate %212 by %c126_i32_100 dim 1 : vector<16x128xf32>, i32 -> vector<16x128xf32>
      %224 = vector.broadcast %222 : f32 to vector<16x128xf32>
      %225 = arith.mulf %224, %223 : vector<16x128xf32>
      %226 = arith.addf %221, %225 : vector<16x128xf32>
      %c31 = arith.constant 31 : index
      %227 = memref.load %arg3[%c31] : memref<98xf32, #tpu.memory_space<smem>>
      %c125_i32_101 = arith.constant 125 : i32
      %228 = tpu.dynamic_rotate %212 by %c125_i32_101 dim 1 : vector<16x128xf32>, i32 -> vector<16x128xf32>
      %229 = vector.broadcast %227 : f32 to vector<16x128xf32>
      %230 = arith.mulf %229, %228 : vector<16x128xf32>
      %231 = arith.addf %226, %230 : vector<16x128xf32>
      %c32 = arith.constant 32 : index
      %232 = memref.load %arg3[%c32] : memref<98xf32, #tpu.memory_space<smem>>
      %c124_i32_102 = arith.constant 124 : i32
      %233 = tpu.dynamic_rotate %212 by %c124_i32_102 dim 1 : vector<16x128xf32>, i32 -> vector<16x128xf32>
      %234 = vector.broadcast %232 : f32 to vector<16x128xf32>
      %235 = arith.mulf %234, %233 : vector<16x128xf32>
      %236 = arith.addf %231, %235 : vector<16x128xf32>
      %c33 = arith.constant 33 : index
      %237 = memref.load %arg3[%c33] : memref<98xf32, #tpu.memory_space<smem>>
      %c123_i32_103 = arith.constant 123 : i32
      %238 = tpu.dynamic_rotate %212 by %c123_i32_103 dim 1 : vector<16x128xf32>, i32 -> vector<16x128xf32>
      %239 = vector.broadcast %237 : f32 to vector<16x128xf32>
      %240 = arith.mulf %239, %238 : vector<16x128xf32>
      %241 = arith.addf %236, %240 : vector<16x128xf32>
      %c34 = arith.constant 34 : index
      %242 = memref.load %arg3[%c34] : memref<98xf32, #tpu.memory_space<smem>>
      %c122_i32_104 = arith.constant 122 : i32
      %243 = tpu.dynamic_rotate %212 by %c122_i32_104 dim 1 : vector<16x128xf32>, i32 -> vector<16x128xf32>
      %244 = vector.broadcast %242 : f32 to vector<16x128xf32>
      %245 = arith.mulf %244, %243 : vector<16x128xf32>
      %246 = arith.addf %241, %245 : vector<16x128xf32>
      %c0_105 = arith.constant 0 : index
      %c5_106 = arith.constant 5 : index
      %c0_107 = arith.constant 0 : index
      %247 = vector.load %arg7[%c0_105, %c5_106, %c0_107] : memref<2x22x128xf32, #tpu.memory_space<vmem>>, vector<1x16x128xf32>
      %248 = vector.shape_cast %247 : vector<1x16x128xf32> to vector<16x128xf32>
      %c35 = arith.constant 35 : index
      %249 = memref.load %arg3[%c35] : memref<98xf32, #tpu.memory_space<smem>>
      %250 = vector.broadcast %249 : f32 to vector<16x128xf32>
      %251 = arith.mulf %250, %248 : vector<16x128xf32>
      %252 = arith.addf %246, %251 : vector<16x128xf32>
      %c36 = arith.constant 36 : index
      %253 = memref.load %arg3[%c36] : memref<98xf32, #tpu.memory_space<smem>>
      %c127_i32_108 = arith.constant 127 : i32
      %254 = tpu.dynamic_rotate %248 by %c127_i32_108 dim 1 : vector<16x128xf32>, i32 -> vector<16x128xf32>
      %255 = vector.broadcast %253 : f32 to vector<16x128xf32>
      %256 = arith.mulf %255, %254 : vector<16x128xf32>
      %257 = arith.addf %252, %256 : vector<16x128xf32>
      %c37 = arith.constant 37 : index
      %258 = memref.load %arg3[%c37] : memref<98xf32, #tpu.memory_space<smem>>
      %c126_i32_109 = arith.constant 126 : i32
      %259 = tpu.dynamic_rotate %248 by %c126_i32_109 dim 1 : vector<16x128xf32>, i32 -> vector<16x128xf32>
      %260 = vector.broadcast %258 : f32 to vector<16x128xf32>
      %261 = arith.mulf %260, %259 : vector<16x128xf32>
      %262 = arith.addf %257, %261 : vector<16x128xf32>
      %c38 = arith.constant 38 : index
      %263 = memref.load %arg3[%c38] : memref<98xf32, #tpu.memory_space<smem>>
      %c125_i32_110 = arith.constant 125 : i32
      %264 = tpu.dynamic_rotate %248 by %c125_i32_110 dim 1 : vector<16x128xf32>, i32 -> vector<16x128xf32>
      %265 = vector.broadcast %263 : f32 to vector<16x128xf32>
      %266 = arith.mulf %265, %264 : vector<16x128xf32>
      %267 = arith.addf %262, %266 : vector<16x128xf32>
      %c39 = arith.constant 39 : index
      %268 = memref.load %arg3[%c39] : memref<98xf32, #tpu.memory_space<smem>>
      %c124_i32_111 = arith.constant 124 : i32
      %269 = tpu.dynamic_rotate %248 by %c124_i32_111 dim 1 : vector<16x128xf32>, i32 -> vector<16x128xf32>
      %270 = vector.broadcast %268 : f32 to vector<16x128xf32>
      %271 = arith.mulf %270, %269 : vector<16x128xf32>
      %272 = arith.addf %267, %271 : vector<16x128xf32>
      %c40 = arith.constant 40 : index
      %273 = memref.load %arg3[%c40] : memref<98xf32, #tpu.memory_space<smem>>
      %c123_i32_112 = arith.constant 123 : i32
      %274 = tpu.dynamic_rotate %248 by %c123_i32_112 dim 1 : vector<16x128xf32>, i32 -> vector<16x128xf32>
      %275 = vector.broadcast %273 : f32 to vector<16x128xf32>
      %276 = arith.mulf %275, %274 : vector<16x128xf32>
      %277 = arith.addf %272, %276 : vector<16x128xf32>
      %c41 = arith.constant 41 : index
      %278 = memref.load %arg3[%c41] : memref<98xf32, #tpu.memory_space<smem>>
      %c122_i32_113 = arith.constant 122 : i32
      %279 = tpu.dynamic_rotate %248 by %c122_i32_113 dim 1 : vector<16x128xf32>, i32 -> vector<16x128xf32>
      %280 = vector.broadcast %278 : f32 to vector<16x128xf32>
      %281 = arith.mulf %280, %279 : vector<16x128xf32>
      %282 = arith.addf %277, %281 : vector<16x128xf32>
      %c0_114 = arith.constant 0 : index
      %c6_115 = arith.constant 6 : index
      %c0_116 = arith.constant 0 : index
      %283 = vector.load %arg7[%c0_114, %c6_115, %c0_116] : memref<2x22x128xf32, #tpu.memory_space<vmem>>, vector<1x16x128xf32>
      %284 = vector.shape_cast %283 : vector<1x16x128xf32> to vector<16x128xf32>
      %c42 = arith.constant 42 : index
      %285 = memref.load %arg3[%c42] : memref<98xf32, #tpu.memory_space<smem>>
      %286 = vector.broadcast %285 : f32 to vector<16x128xf32>
      %287 = arith.mulf %286, %284 : vector<16x128xf32>
      %288 = arith.addf %282, %287 : vector<16x128xf32>
      %c43 = arith.constant 43 : index
      %289 = memref.load %arg3[%c43] : memref<98xf32, #tpu.memory_space<smem>>
      %c127_i32_117 = arith.constant 127 : i32
      %290 = tpu.dynamic_rotate %284 by %c127_i32_117 dim 1 : vector<16x128xf32>, i32 -> vector<16x128xf32>
      %291 = vector.broadcast %289 : f32 to vector<16x128xf32>
      %292 = arith.mulf %291, %290 : vector<16x128xf32>
      %293 = arith.addf %288, %292 : vector<16x128xf32>
      %c44 = arith.constant 44 : index
      %294 = memref.load %arg3[%c44] : memref<98xf32, #tpu.memory_space<smem>>
      %c126_i32_118 = arith.constant 126 : i32
      %295 = tpu.dynamic_rotate %284 by %c126_i32_118 dim 1 : vector<16x128xf32>, i32 -> vector<16x128xf32>
      %296 = vector.broadcast %294 : f32 to vector<16x128xf32>
      %297 = arith.mulf %296, %295 : vector<16x128xf32>
      %298 = arith.addf %293, %297 : vector<16x128xf32>
      %c45 = arith.constant 45 : index
      %299 = memref.load %arg3[%c45] : memref<98xf32, #tpu.memory_space<smem>>
      %c125_i32_119 = arith.constant 125 : i32
      %300 = tpu.dynamic_rotate %284 by %c125_i32_119 dim 1 : vector<16x128xf32>, i32 -> vector<16x128xf32>
      %301 = vector.broadcast %299 : f32 to vector<16x128xf32>
      %302 = arith.mulf %301, %300 : vector<16x128xf32>
      %303 = arith.addf %298, %302 : vector<16x128xf32>
      %c46 = arith.constant 46 : index
      %304 = memref.load %arg3[%c46] : memref<98xf32, #tpu.memory_space<smem>>
      %c124_i32_120 = arith.constant 124 : i32
      %305 = tpu.dynamic_rotate %284 by %c124_i32_120 dim 1 : vector<16x128xf32>, i32 -> vector<16x128xf32>
      %306 = vector.broadcast %304 : f32 to vector<16x128xf32>
      %307 = arith.mulf %306, %305 : vector<16x128xf32>
      %308 = arith.addf %303, %307 : vector<16x128xf32>
      %c47 = arith.constant 47 : index
      %309 = memref.load %arg3[%c47] : memref<98xf32, #tpu.memory_space<smem>>
      %c123_i32_121 = arith.constant 123 : i32
      %310 = tpu.dynamic_rotate %284 by %c123_i32_121 dim 1 : vector<16x128xf32>, i32 -> vector<16x128xf32>
      %311 = vector.broadcast %309 : f32 to vector<16x128xf32>
      %312 = arith.mulf %311, %310 : vector<16x128xf32>
      %313 = arith.addf %308, %312 : vector<16x128xf32>
      %c48 = arith.constant 48 : index
      %314 = memref.load %arg3[%c48] : memref<98xf32, #tpu.memory_space<smem>>
      %c122_i32_122 = arith.constant 122 : i32
      %315 = tpu.dynamic_rotate %284 by %c122_i32_122 dim 1 : vector<16x128xf32>, i32 -> vector<16x128xf32>
      %316 = vector.broadcast %314 : f32 to vector<16x128xf32>
      %317 = arith.mulf %316, %315 : vector<16x128xf32>
      %318 = arith.addf %313, %317 : vector<16x128xf32>
      %c1_123 = arith.constant 1 : index
      %c0_124 = arith.constant 0 : index
      %c0_125 = arith.constant 0 : index
      %319 = vector.load %arg7[%c1_123, %c0_124, %c0_125] : memref<2x22x128xf32, #tpu.memory_space<vmem>>, vector<1x16x128xf32>
      %320 = vector.shape_cast %319 : vector<1x16x128xf32> to vector<16x128xf32>
      %c49 = arith.constant 49 : index
      %321 = memref.load %arg3[%c49] : memref<98xf32, #tpu.memory_space<smem>>
      %322 = vector.broadcast %321 : f32 to vector<16x128xf32>
      %323 = arith.mulf %322, %320 : vector<16x128xf32>
      %324 = arith.addf %318, %323 : vector<16x128xf32>
      %c50 = arith.constant 50 : index
      %325 = memref.load %arg3[%c50] : memref<98xf32, #tpu.memory_space<smem>>
      %c127_i32_126 = arith.constant 127 : i32
      %326 = tpu.dynamic_rotate %320 by %c127_i32_126 dim 1 : vector<16x128xf32>, i32 -> vector<16x128xf32>
      %327 = vector.broadcast %325 : f32 to vector<16x128xf32>
      %328 = arith.mulf %327, %326 : vector<16x128xf32>
      %329 = arith.addf %324, %328 : vector<16x128xf32>
      %c51 = arith.constant 51 : index
      %330 = memref.load %arg3[%c51] : memref<98xf32, #tpu.memory_space<smem>>
      %c126_i32_127 = arith.constant 126 : i32
      %331 = tpu.dynamic_rotate %320 by %c126_i32_127 dim 1 : vector<16x128xf32>, i32 -> vector<16x128xf32>
      %332 = vector.broadcast %330 : f32 to vector<16x128xf32>
      %333 = arith.mulf %332, %331 : vector<16x128xf32>
      %334 = arith.addf %329, %333 : vector<16x128xf32>
      %c52 = arith.constant 52 : index
      %335 = memref.load %arg3[%c52] : memref<98xf32, #tpu.memory_space<smem>>
      %c125_i32_128 = arith.constant 125 : i32
      %336 = tpu.dynamic_rotate %320 by %c125_i32_128 dim 1 : vector<16x128xf32>, i32 -> vector<16x128xf32>
      %337 = vector.broadcast %335 : f32 to vector<16x128xf32>
      %338 = arith.mulf %337, %336 : vector<16x128xf32>
      %339 = arith.addf %334, %338 : vector<16x128xf32>
      %c53 = arith.constant 53 : index
      %340 = memref.load %arg3[%c53] : memref<98xf32, #tpu.memory_space<smem>>
      %c124_i32_129 = arith.constant 124 : i32
      %341 = tpu.dynamic_rotate %320 by %c124_i32_129 dim 1 : vector<16x128xf32>, i32 -> vector<16x128xf32>
      %342 = vector.broadcast %340 : f32 to vector<16x128xf32>
      %343 = arith.mulf %342, %341 : vector<16x128xf32>
      %344 = arith.addf %339, %343 : vector<16x128xf32>
      %c54 = arith.constant 54 : index
      %345 = memref.load %arg3[%c54] : memref<98xf32, #tpu.memory_space<smem>>
      %c123_i32_130 = arith.constant 123 : i32
      %346 = tpu.dynamic_rotate %320 by %c123_i32_130 dim 1 : vector<16x128xf32>, i32 -> vector<16x128xf32>
      %347 = vector.broadcast %345 : f32 to vector<16x128xf32>
      %348 = arith.mulf %347, %346 : vector<16x128xf32>
      %349 = arith.addf %344, %348 : vector<16x128xf32>
      %c55 = arith.constant 55 : index
      %350 = memref.load %arg3[%c55] : memref<98xf32, #tpu.memory_space<smem>>
      %c122_i32_131 = arith.constant 122 : i32
      %351 = tpu.dynamic_rotate %320 by %c122_i32_131 dim 1 : vector<16x128xf32>, i32 -> vector<16x128xf32>
      %352 = vector.broadcast %350 : f32 to vector<16x128xf32>
      %353 = arith.mulf %352, %351 : vector<16x128xf32>
      %354 = arith.addf %349, %353 : vector<16x128xf32>
      %c1_132 = arith.constant 1 : index
      %c1_133 = arith.constant 1 : index
      %c0_134 = arith.constant 0 : index
      %355 = vector.load %arg7[%c1_132, %c1_133, %c0_134] : memref<2x22x128xf32, #tpu.memory_space<vmem>>, vector<1x16x128xf32>
      %356 = vector.shape_cast %355 : vector<1x16x128xf32> to vector<16x128xf32>
      %c56 = arith.constant 56 : index
      %357 = memref.load %arg3[%c56] : memref<98xf32, #tpu.memory_space<smem>>
      %358 = vector.broadcast %357 : f32 to vector<16x128xf32>
      %359 = arith.mulf %358, %356 : vector<16x128xf32>
      %360 = arith.addf %354, %359 : vector<16x128xf32>
      %c57 = arith.constant 57 : index
      %361 = memref.load %arg3[%c57] : memref<98xf32, #tpu.memory_space<smem>>
      %c127_i32_135 = arith.constant 127 : i32
      %362 = tpu.dynamic_rotate %356 by %c127_i32_135 dim 1 : vector<16x128xf32>, i32 -> vector<16x128xf32>
      %363 = vector.broadcast %361 : f32 to vector<16x128xf32>
      %364 = arith.mulf %363, %362 : vector<16x128xf32>
      %365 = arith.addf %360, %364 : vector<16x128xf32>
      %c58 = arith.constant 58 : index
      %366 = memref.load %arg3[%c58] : memref<98xf32, #tpu.memory_space<smem>>
      %c126_i32_136 = arith.constant 126 : i32
      %367 = tpu.dynamic_rotate %356 by %c126_i32_136 dim 1 : vector<16x128xf32>, i32 -> vector<16x128xf32>
      %368 = vector.broadcast %366 : f32 to vector<16x128xf32>
      %369 = arith.mulf %368, %367 : vector<16x128xf32>
      %370 = arith.addf %365, %369 : vector<16x128xf32>
      %c59 = arith.constant 59 : index
      %371 = memref.load %arg3[%c59] : memref<98xf32, #tpu.memory_space<smem>>
      %c125_i32_137 = arith.constant 125 : i32
      %372 = tpu.dynamic_rotate %356 by %c125_i32_137 dim 1 : vector<16x128xf32>, i32 -> vector<16x128xf32>
      %373 = vector.broadcast %371 : f32 to vector<16x128xf32>
      %374 = arith.mulf %373, %372 : vector<16x128xf32>
      %375 = arith.addf %370, %374 : vector<16x128xf32>
      %c60 = arith.constant 60 : index
      %376 = memref.load %arg3[%c60] : memref<98xf32, #tpu.memory_space<smem>>
      %c124_i32_138 = arith.constant 124 : i32
      %377 = tpu.dynamic_rotate %356 by %c124_i32_138 dim 1 : vector<16x128xf32>, i32 -> vector<16x128xf32>
      %378 = vector.broadcast %376 : f32 to vector<16x128xf32>
      %379 = arith.mulf %378, %377 : vector<16x128xf32>
      %380 = arith.addf %375, %379 : vector<16x128xf32>
      %c61 = arith.constant 61 : index
      %381 = memref.load %arg3[%c61] : memref<98xf32, #tpu.memory_space<smem>>
      %c123_i32_139 = arith.constant 123 : i32
      %382 = tpu.dynamic_rotate %356 by %c123_i32_139 dim 1 : vector<16x128xf32>, i32 -> vector<16x128xf32>
      %383 = vector.broadcast %381 : f32 to vector<16x128xf32>
      %384 = arith.mulf %383, %382 : vector<16x128xf32>
      %385 = arith.addf %380, %384 : vector<16x128xf32>
      %c62 = arith.constant 62 : index
      %386 = memref.load %arg3[%c62] : memref<98xf32, #tpu.memory_space<smem>>
      %c122_i32_140 = arith.constant 122 : i32
      %387 = tpu.dynamic_rotate %356 by %c122_i32_140 dim 1 : vector<16x128xf32>, i32 -> vector<16x128xf32>
      %388 = vector.broadcast %386 : f32 to vector<16x128xf32>
      %389 = arith.mulf %388, %387 : vector<16x128xf32>
      %390 = arith.addf %385, %389 : vector<16x128xf32>
      %c1_141 = arith.constant 1 : index
      %c2_142 = arith.constant 2 : index
      %c0_143 = arith.constant 0 : index
      %391 = vector.load %arg7[%c1_141, %c2_142, %c0_143] : memref<2x22x128xf32, #tpu.memory_space<vmem>>, vector<1x16x128xf32>
      %392 = vector.shape_cast %391 : vector<1x16x128xf32> to vector<16x128xf32>
      %c63 = arith.constant 63 : index
      %393 = memref.load %arg3[%c63] : memref<98xf32, #tpu.memory_space<smem>>
      %394 = vector.broadcast %393 : f32 to vector<16x128xf32>
      %395 = arith.mulf %394, %392 : vector<16x128xf32>
      %396 = arith.addf %390, %395 : vector<16x128xf32>
      %c64 = arith.constant 64 : index
      %397 = memref.load %arg3[%c64] : memref<98xf32, #tpu.memory_space<smem>>
      %c127_i32_144 = arith.constant 127 : i32
      %398 = tpu.dynamic_rotate %392 by %c127_i32_144 dim 1 : vector<16x128xf32>, i32 -> vector<16x128xf32>
      %399 = vector.broadcast %397 : f32 to vector<16x128xf32>
      %400 = arith.mulf %399, %398 : vector<16x128xf32>
      %401 = arith.addf %396, %400 : vector<16x128xf32>
      %c65 = arith.constant 65 : index
      %402 = memref.load %arg3[%c65] : memref<98xf32, #tpu.memory_space<smem>>
      %c126_i32_145 = arith.constant 126 : i32
      %403 = tpu.dynamic_rotate %392 by %c126_i32_145 dim 1 : vector<16x128xf32>, i32 -> vector<16x128xf32>
      %404 = vector.broadcast %402 : f32 to vector<16x128xf32>
      %405 = arith.mulf %404, %403 : vector<16x128xf32>
      %406 = arith.addf %401, %405 : vector<16x128xf32>
      %c66 = arith.constant 66 : index
      %407 = memref.load %arg3[%c66] : memref<98xf32, #tpu.memory_space<smem>>
      %c125_i32_146 = arith.constant 125 : i32
      %408 = tpu.dynamic_rotate %392 by %c125_i32_146 dim 1 : vector<16x128xf32>, i32 -> vector<16x128xf32>
      %409 = vector.broadcast %407 : f32 to vector<16x128xf32>
      %410 = arith.mulf %409, %408 : vector<16x128xf32>
      %411 = arith.addf %406, %410 : vector<16x128xf32>
      %c67 = arith.constant 67 : index
      %412 = memref.load %arg3[%c67] : memref<98xf32, #tpu.memory_space<smem>>
      %c124_i32_147 = arith.constant 124 : i32
      %413 = tpu.dynamic_rotate %392 by %c124_i32_147 dim 1 : vector<16x128xf32>, i32 -> vector<16x128xf32>
      %414 = vector.broadcast %412 : f32 to vector<16x128xf32>
      %415 = arith.mulf %414, %413 : vector<16x128xf32>
      %416 = arith.addf %411, %415 : vector<16x128xf32>
      %c68 = arith.constant 68 : index
      %417 = memref.load %arg3[%c68] : memref<98xf32, #tpu.memory_space<smem>>
      %c123_i32_148 = arith.constant 123 : i32
      %418 = tpu.dynamic_rotate %392 by %c123_i32_148 dim 1 : vector<16x128xf32>, i32 -> vector<16x128xf32>
      %419 = vector.broadcast %417 : f32 to vector<16x128xf32>
      %420 = arith.mulf %419, %418 : vector<16x128xf32>
      %421 = arith.addf %416, %420 : vector<16x128xf32>
      %c69 = arith.constant 69 : index
      %422 = memref.load %arg3[%c69] : memref<98xf32, #tpu.memory_space<smem>>
      %c122_i32_149 = arith.constant 122 : i32
      %423 = tpu.dynamic_rotate %392 by %c122_i32_149 dim 1 : vector<16x128xf32>, i32 -> vector<16x128xf32>
      %424 = vector.broadcast %422 : f32 to vector<16x128xf32>
      %425 = arith.mulf %424, %423 : vector<16x128xf32>
      %426 = arith.addf %421, %425 : vector<16x128xf32>
      %c1_150 = arith.constant 1 : index
      %c3_151 = arith.constant 3 : index
      %c0_152 = arith.constant 0 : index
      %427 = vector.load %arg7[%c1_150, %c3_151, %c0_152] : memref<2x22x128xf32, #tpu.memory_space<vmem>>, vector<1x16x128xf32>
      %428 = vector.shape_cast %427 : vector<1x16x128xf32> to vector<16x128xf32>
      %c70 = arith.constant 70 : index
      %429 = memref.load %arg3[%c70] : memref<98xf32, #tpu.memory_space<smem>>
      %430 = vector.broadcast %429 : f32 to vector<16x128xf32>
      %431 = arith.mulf %430, %428 : vector<16x128xf32>
      %432 = arith.addf %426, %431 : vector<16x128xf32>
      %c71 = arith.constant 71 : index
      %433 = memref.load %arg3[%c71] : memref<98xf32, #tpu.memory_space<smem>>
      %c127_i32_153 = arith.constant 127 : i32
      %434 = tpu.dynamic_rotate %428 by %c127_i32_153 dim 1 : vector<16x128xf32>, i32 -> vector<16x128xf32>
      %435 = vector.broadcast %433 : f32 to vector<16x128xf32>
      %436 = arith.mulf %435, %434 : vector<16x128xf32>
      %437 = arith.addf %432, %436 : vector<16x128xf32>
      %c72 = arith.constant 72 : index
      %438 = memref.load %arg3[%c72] : memref<98xf32, #tpu.memory_space<smem>>
      %c126_i32_154 = arith.constant 126 : i32
      %439 = tpu.dynamic_rotate %428 by %c126_i32_154 dim 1 : vector<16x128xf32>, i32 -> vector<16x128xf32>
      %440 = vector.broadcast %438 : f32 to vector<16x128xf32>
      %441 = arith.mulf %440, %439 : vector<16x128xf32>
      %442 = arith.addf %437, %441 : vector<16x128xf32>
      %c73 = arith.constant 73 : index
      %443 = memref.load %arg3[%c73] : memref<98xf32, #tpu.memory_space<smem>>
      %c125_i32_155 = arith.constant 125 : i32
      %444 = tpu.dynamic_rotate %428 by %c125_i32_155 dim 1 : vector<16x128xf32>, i32 -> vector<16x128xf32>
      %445 = vector.broadcast %443 : f32 to vector<16x128xf32>
      %446 = arith.mulf %445, %444 : vector<16x128xf32>
      %447 = arith.addf %442, %446 : vector<16x128xf32>
      %c74 = arith.constant 74 : index
      %448 = memref.load %arg3[%c74] : memref<98xf32, #tpu.memory_space<smem>>
      %c124_i32_156 = arith.constant 124 : i32
      %449 = tpu.dynamic_rotate %428 by %c124_i32_156 dim 1 : vector<16x128xf32>, i32 -> vector<16x128xf32>
      %450 = vector.broadcast %448 : f32 to vector<16x128xf32>
      %451 = arith.mulf %450, %449 : vector<16x128xf32>
      %452 = arith.addf %447, %451 : vector<16x128xf32>
      %c75 = arith.constant 75 : index
      %453 = memref.load %arg3[%c75] : memref<98xf32, #tpu.memory_space<smem>>
      %c123_i32_157 = arith.constant 123 : i32
      %454 = tpu.dynamic_rotate %428 by %c123_i32_157 dim 1 : vector<16x128xf32>, i32 -> vector<16x128xf32>
      %455 = vector.broadcast %453 : f32 to vector<16x128xf32>
      %456 = arith.mulf %455, %454 : vector<16x128xf32>
      %457 = arith.addf %452, %456 : vector<16x128xf32>
      %c76 = arith.constant 76 : index
      %458 = memref.load %arg3[%c76] : memref<98xf32, #tpu.memory_space<smem>>
      %c122_i32_158 = arith.constant 122 : i32
      %459 = tpu.dynamic_rotate %428 by %c122_i32_158 dim 1 : vector<16x128xf32>, i32 -> vector<16x128xf32>
      %460 = vector.broadcast %458 : f32 to vector<16x128xf32>
      %461 = arith.mulf %460, %459 : vector<16x128xf32>
      %462 = arith.addf %457, %461 : vector<16x128xf32>
      %c1_159 = arith.constant 1 : index
      %c4_160 = arith.constant 4 : index
      %c0_161 = arith.constant 0 : index
      %463 = vector.load %arg7[%c1_159, %c4_160, %c0_161] : memref<2x22x128xf32, #tpu.memory_space<vmem>>, vector<1x16x128xf32>
      %464 = vector.shape_cast %463 : vector<1x16x128xf32> to vector<16x128xf32>
      %c77 = arith.constant 77 : index
      %465 = memref.load %arg3[%c77] : memref<98xf32, #tpu.memory_space<smem>>
      %466 = vector.broadcast %465 : f32 to vector<16x128xf32>
      %467 = arith.mulf %466, %464 : vector<16x128xf32>
      %468 = arith.addf %462, %467 : vector<16x128xf32>
      %c78 = arith.constant 78 : index
      %469 = memref.load %arg3[%c78] : memref<98xf32, #tpu.memory_space<smem>>
      %c127_i32_162 = arith.constant 127 : i32
      %470 = tpu.dynamic_rotate %464 by %c127_i32_162 dim 1 : vector<16x128xf32>, i32 -> vector<16x128xf32>
      %471 = vector.broadcast %469 : f32 to vector<16x128xf32>
      %472 = arith.mulf %471, %470 : vector<16x128xf32>
      %473 = arith.addf %468, %472 : vector<16x128xf32>
      %c79 = arith.constant 79 : index
      %474 = memref.load %arg3[%c79] : memref<98xf32, #tpu.memory_space<smem>>
      %c126_i32_163 = arith.constant 126 : i32
      %475 = tpu.dynamic_rotate %464 by %c126_i32_163 dim 1 : vector<16x128xf32>, i32 -> vector<16x128xf32>
      %476 = vector.broadcast %474 : f32 to vector<16x128xf32>
      %477 = arith.mulf %476, %475 : vector<16x128xf32>
      %478 = arith.addf %473, %477 : vector<16x128xf32>
      %c80 = arith.constant 80 : index
      %479 = memref.load %arg3[%c80] : memref<98xf32, #tpu.memory_space<smem>>
      %c125_i32_164 = arith.constant 125 : i32
      %480 = tpu.dynamic_rotate %464 by %c125_i32_164 dim 1 : vector<16x128xf32>, i32 -> vector<16x128xf32>
      %481 = vector.broadcast %479 : f32 to vector<16x128xf32>
      %482 = arith.mulf %481, %480 : vector<16x128xf32>
      %483 = arith.addf %478, %482 : vector<16x128xf32>
      %c81 = arith.constant 81 : index
      %484 = memref.load %arg3[%c81] : memref<98xf32, #tpu.memory_space<smem>>
      %c124_i32_165 = arith.constant 124 : i32
      %485 = tpu.dynamic_rotate %464 by %c124_i32_165 dim 1 : vector<16x128xf32>, i32 -> vector<16x128xf32>
      %486 = vector.broadcast %484 : f32 to vector<16x128xf32>
      %487 = arith.mulf %486, %485 : vector<16x128xf32>
      %488 = arith.addf %483, %487 : vector<16x128xf32>
      %c82 = arith.constant 82 : index
      %489 = memref.load %arg3[%c82] : memref<98xf32, #tpu.memory_space<smem>>
      %c123_i32_166 = arith.constant 123 : i32
      %490 = tpu.dynamic_rotate %464 by %c123_i32_166 dim 1 : vector<16x128xf32>, i32 -> vector<16x128xf32>
      %491 = vector.broadcast %489 : f32 to vector<16x128xf32>
      %492 = arith.mulf %491, %490 : vector<16x128xf32>
      %493 = arith.addf %488, %492 : vector<16x128xf32>
      %c83 = arith.constant 83 : index
      %494 = memref.load %arg3[%c83] : memref<98xf32, #tpu.memory_space<smem>>
      %c122_i32_167 = arith.constant 122 : i32
      %495 = tpu.dynamic_rotate %464 by %c122_i32_167 dim 1 : vector<16x128xf32>, i32 -> vector<16x128xf32>
      %496 = vector.broadcast %494 : f32 to vector<16x128xf32>
      %497 = arith.mulf %496, %495 : vector<16x128xf32>
      %498 = arith.addf %493, %497 : vector<16x128xf32>
      %c1_168 = arith.constant 1 : index
      %c5_169 = arith.constant 5 : index
      %c0_170 = arith.constant 0 : index
      %499 = vector.load %arg7[%c1_168, %c5_169, %c0_170] : memref<2x22x128xf32, #tpu.memory_space<vmem>>, vector<1x16x128xf32>
      %500 = vector.shape_cast %499 : vector<1x16x128xf32> to vector<16x128xf32>
      %c84 = arith.constant 84 : index
      %501 = memref.load %arg3[%c84] : memref<98xf32, #tpu.memory_space<smem>>
      %502 = vector.broadcast %501 : f32 to vector<16x128xf32>
      %503 = arith.mulf %502, %500 : vector<16x128xf32>
      %504 = arith.addf %498, %503 : vector<16x128xf32>
      %c85 = arith.constant 85 : index
      %505 = memref.load %arg3[%c85] : memref<98xf32, #tpu.memory_space<smem>>
      %c127_i32_171 = arith.constant 127 : i32
      %506 = tpu.dynamic_rotate %500 by %c127_i32_171 dim 1 : vector<16x128xf32>, i32 -> vector<16x128xf32>
      %507 = vector.broadcast %505 : f32 to vector<16x128xf32>
      %508 = arith.mulf %507, %506 : vector<16x128xf32>
      %509 = arith.addf %504, %508 : vector<16x128xf32>
      %c86 = arith.constant 86 : index
      %510 = memref.load %arg3[%c86] : memref<98xf32, #tpu.memory_space<smem>>
      %c126_i32_172 = arith.constant 126 : i32
      %511 = tpu.dynamic_rotate %500 by %c126_i32_172 dim 1 : vector<16x128xf32>, i32 -> vector<16x128xf32>
      %512 = vector.broadcast %510 : f32 to vector<16x128xf32>
      %513 = arith.mulf %512, %511 : vector<16x128xf32>
      %514 = arith.addf %509, %513 : vector<16x128xf32>
      %c87 = arith.constant 87 : index
      %515 = memref.load %arg3[%c87] : memref<98xf32, #tpu.memory_space<smem>>
      %c125_i32_173 = arith.constant 125 : i32
      %516 = tpu.dynamic_rotate %500 by %c125_i32_173 dim 1 : vector<16x128xf32>, i32 -> vector<16x128xf32>
      %517 = vector.broadcast %515 : f32 to vector<16x128xf32>
      %518 = arith.mulf %517, %516 : vector<16x128xf32>
      %519 = arith.addf %514, %518 : vector<16x128xf32>
      %c88 = arith.constant 88 : index
      %520 = memref.load %arg3[%c88] : memref<98xf32, #tpu.memory_space<smem>>
      %c124_i32_174 = arith.constant 124 : i32
      %521 = tpu.dynamic_rotate %500 by %c124_i32_174 dim 1 : vector<16x128xf32>, i32 -> vector<16x128xf32>
      %522 = vector.broadcast %520 : f32 to vector<16x128xf32>
      %523 = arith.mulf %522, %521 : vector<16x128xf32>
      %524 = arith.addf %519, %523 : vector<16x128xf32>
      %c89 = arith.constant 89 : index
      %525 = memref.load %arg3[%c89] : memref<98xf32, #tpu.memory_space<smem>>
      %c123_i32_175 = arith.constant 123 : i32
      %526 = tpu.dynamic_rotate %500 by %c123_i32_175 dim 1 : vector<16x128xf32>, i32 -> vector<16x128xf32>
      %527 = vector.broadcast %525 : f32 to vector<16x128xf32>
      %528 = arith.mulf %527, %526 : vector<16x128xf32>
      %529 = arith.addf %524, %528 : vector<16x128xf32>
      %c90 = arith.constant 90 : index
      %530 = memref.load %arg3[%c90] : memref<98xf32, #tpu.memory_space<smem>>
      %c122_i32_176 = arith.constant 122 : i32
      %531 = tpu.dynamic_rotate %500 by %c122_i32_176 dim 1 : vector<16x128xf32>, i32 -> vector<16x128xf32>
      %532 = vector.broadcast %530 : f32 to vector<16x128xf32>
      %533 = arith.mulf %532, %531 : vector<16x128xf32>
      %534 = arith.addf %529, %533 : vector<16x128xf32>
      %c1_177 = arith.constant 1 : index
      %c6_178 = arith.constant 6 : index
      %c0_179 = arith.constant 0 : index
      %535 = vector.load %arg7[%c1_177, %c6_178, %c0_179] : memref<2x22x128xf32, #tpu.memory_space<vmem>>, vector<1x16x128xf32>
      %536 = vector.shape_cast %535 : vector<1x16x128xf32> to vector<16x128xf32>
      %c91 = arith.constant 91 : index
      %537 = memref.load %arg3[%c91] : memref<98xf32, #tpu.memory_space<smem>>
      %538 = vector.broadcast %537 : f32 to vector<16x128xf32>
      %539 = arith.mulf %538, %536 : vector<16x128xf32>
      %540 = arith.addf %534, %539 : vector<16x128xf32>
      %c92 = arith.constant 92 : index
      %541 = memref.load %arg3[%c92] : memref<98xf32, #tpu.memory_space<smem>>
      %c127_i32_180 = arith.constant 127 : i32
      %542 = tpu.dynamic_rotate %536 by %c127_i32_180 dim 1 : vector<16x128xf32>, i32 -> vector<16x128xf32>
      %543 = vector.broadcast %541 : f32 to vector<16x128xf32>
      %544 = arith.mulf %543, %542 : vector<16x128xf32>
      %545 = arith.addf %540, %544 : vector<16x128xf32>
      %c93 = arith.constant 93 : index
      %546 = memref.load %arg3[%c93] : memref<98xf32, #tpu.memory_space<smem>>
      %c126_i32_181 = arith.constant 126 : i32
      %547 = tpu.dynamic_rotate %536 by %c126_i32_181 dim 1 : vector<16x128xf32>, i32 -> vector<16x128xf32>
      %548 = vector.broadcast %546 : f32 to vector<16x128xf32>
      %549 = arith.mulf %548, %547 : vector<16x128xf32>
      %550 = arith.addf %545, %549 : vector<16x128xf32>
      %c94 = arith.constant 94 : index
      %551 = memref.load %arg3[%c94] : memref<98xf32, #tpu.memory_space<smem>>
      %c125_i32_182 = arith.constant 125 : i32
      %552 = tpu.dynamic_rotate %536 by %c125_i32_182 dim 1 : vector<16x128xf32>, i32 -> vector<16x128xf32>
      %553 = vector.broadcast %551 : f32 to vector<16x128xf32>
      %554 = arith.mulf %553, %552 : vector<16x128xf32>
      %555 = arith.addf %550, %554 : vector<16x128xf32>
      %c95 = arith.constant 95 : index
      %556 = memref.load %arg3[%c95] : memref<98xf32, #tpu.memory_space<smem>>
      %c124_i32_183 = arith.constant 124 : i32
      %557 = tpu.dynamic_rotate %536 by %c124_i32_183 dim 1 : vector<16x128xf32>, i32 -> vector<16x128xf32>
      %558 = vector.broadcast %556 : f32 to vector<16x128xf32>
      %559 = arith.mulf %558, %557 : vector<16x128xf32>
      %560 = arith.addf %555, %559 : vector<16x128xf32>
      %c96 = arith.constant 96 : index
      %561 = memref.load %arg3[%c96] : memref<98xf32, #tpu.memory_space<smem>>
      %c123_i32_184 = arith.constant 123 : i32
      %562 = tpu.dynamic_rotate %536 by %c123_i32_184 dim 1 : vector<16x128xf32>, i32 -> vector<16x128xf32>
      %563 = vector.broadcast %561 : f32 to vector<16x128xf32>
      %564 = arith.mulf %563, %562 : vector<16x128xf32>
      %565 = arith.addf %560, %564 : vector<16x128xf32>
      %c97 = arith.constant 97 : index
      %566 = memref.load %arg3[%c97] : memref<98xf32, #tpu.memory_space<smem>>
      %c122_i32_185 = arith.constant 122 : i32
      %567 = tpu.dynamic_rotate %536 by %c122_i32_185 dim 1 : vector<16x128xf32>, i32 -> vector<16x128xf32>
      %568 = vector.broadcast %566 : f32 to vector<16x128xf32>
      %569 = arith.mulf %568, %567 : vector<16x128xf32>
      %570 = arith.addf %565, %569 : vector<16x128xf32>
      %571 = vector.extract_strided_slice %570 {offsets = [0, 0], sizes = [16, 16], strides = [1, 1]} : vector<16x128xf32> to vector<16x16xf32>
      %572 = arith.negf %571 : vector<16x16xf32>
      %573 = math.exp %572 : vector<16x16xf32>
      %cst_186 = arith.constant 1.000000e+00 : f32
      %574 = vector.broadcast %cst_186 : f32 to vector<16x16xf32>
      %575 = arith.addf %574, %573 : vector<16x16xf32>
      %576 = arith.divf %574, %575 : vector<16x16xf32>
      %c0_187 = arith.constant 0 : index
      %c0_188 = arith.constant 0 : index
      %c0_189 = arith.constant 0 : index
      %c0_190 = arith.constant 0 : index
      %577 = vector.load %arg4[%c0_187, %c0_188, %c0_189, %c0_190] : memref<1x1x16x16xf32, #tpu.memory_space<vmem>>, vector<1x1x16x16xf32>
      %578 = vector.shape_cast %577 : vector<1x1x16x16xf32> to vector<16x16xf32>
      %579 = vector.shape_cast %576 : vector<16x16xf32> to vector<1x1x16x16xf32>
      tpu.vector_store %arg4[%c0_187, %c0_188, %c0_189, %c0_190], %579 {strides = array<i32>} : memref<1x1x16x16xf32, #tpu.memory_space<vmem>>, vector<1x1x16x16xf32>,
    } else {
    }
    return
  }
  func.func @transform_0(%arg0: i32, %arg1: i32) -> (i32, i32, i32, i32) {
    %c0_i32 = arith.constant 0 : i32
    %c0_i32_0 = arith.constant 0 : i32
    %c0_i32_1 = arith.constant 0 : i32
    return %arg0, %arg1, %c0_i32, %c0_i32_0 : i32, i32, i32, i32
  }
  func.func @transform_1(%arg0: i32, %arg1: i32) -> i32 {
    %c0_i32 = arith.constant 0 : i32
    %c0_i32_0 = arith.constant 0 : i32
    return %c0_i32 : i32
  }
  func.func @transform_2(%arg0: i32, %arg1: i32) -> (i32, i32, i32, i32) {
    %c0_i32 = arith.constant 0 : i32
    %c0_i32_0 = arith.constant 0 : i32
    %c0_i32_1 = arith.constant 0 : i32
    %c0_i32_2 = arith.constant 0 : i32
    return %arg0, %c0_i32, %c0_i32_0, %c0_i32_1 : i32, i32, i32, i32
  }
}

</mosaic_0001>

<bundles_post_ra>
// kernel: tpu_custom_call.1
= control target key start
LH: loop header
LB: loop body
LE: loop exit
PB: predicated region body
PF: predicated region fallthrough
CT: control target
= control target key end

     0   :  { %7 = vsyncpa [#allocation6], 0  ;;  %s2811_s0 = inlined_call_operand.hbm [shape: f32[2,4,16,16], index: 0, kind: input, shape index: {}]   ;;  %s2812_s1 = inlined_call_operand.vmem [shape: f32[98], index: 1, kind: input, shape index: {}]   ;;  %s2813_s2 = inlined_call_operand.hbm [shape: f32[2,1,16,16], index: 2, kind: output, shape index: {}]  }
   0x1   :  { %9 = vsyncpa [#allocation6 + $0x1], 0 }
   0x2   :  { %10 = vsyncpa [#allocation8], 0 }
   0x3   :  { %11 = vsyncpa [#allocation7], 0 }
   0x4   :  { %13 = vsyncpa [#allocation7 + $0x1], 0  ;;  %s1744_s9 = smov 0   ;;  %s1746_s10 = smov 0  }
   0x5   :  { %s1748_s11 = smov 0   ;;  %s1750_s12 = smov 0  }
   0x6   :  { %s1752_s13 = smov 0   ;;  %s1754_s14 = smov 0  }
   0x7 LB: > { %s1362_s15 = sadd.s32 4294967295, %s1711_s14   ;;  %s1363_s16 = sadd.s32 4294967294, %s1711_s14   ;;  %s1711_s14 = sphi %s1754_s14, %s19_s14   ;;  %s1707_s13 = sphi %s1752_s13, %s2836_s13   ;;  %s1703_s12 = sphi %s1750_s12, %s2835_s12   ;;  %s1699_s11 = sphi %s1748_s11, %s2834_s11   ;;  %s1695_s10 = sphi %s1746_s10, %s2833_s10   ;;  %s1691_s9 = sphi %s1744_s9, %s2832_s9  }
   0x8   : > { %s40_s17 = sadd.s32 1, %s1699_s11  ;;  %p47_p0 = scmp.ne.s32.totalorder %s1699_s11, %s1695_s10 }
   0x9   : > { %p48_p1 = scmp.eq.s32.totalorder %s1711_s14, 0  ;;  %p53_p2 = scmp.ne.s32.totalorder %s1695_s10, %s1691_s9 }
   0xa   : > { %p1782_p3 = scmp.eq.s32.totalorder %s1362_s15, 0  ;;  %p98_p4 = scmp.eq.s32.totalorder %s1362_s15, 1 }
   0xb   : > { %p1786_p5 = por %p48_p1, %p47_p0  ;;  %p104_p6 = scmp.eq.s32.totalorder %s1363_s16, 1 }
   0xc   : > { %s2818_s18 = scalar_select %p1782_p3, 1, 0 }
   0xd   : > { %p1792_p7 = por %p1782_p3, %p53_p2  ;;  %p1796_p8 = por %p98_p4, %p47_p0 }
   0xe   : > { %p1800_p9 = por %p104_p6, %p53_p2  ;;  %p1364_p10 = scmp.ge.s32.totalorder %s1711_s14, 1 }
   0xf   : > { %s2820_s20 = scalar_select %p1792_p7, 1, 0 }
  0x10   : > { %s2821_s21 = scalar_select %p1796_p8, 1, 0 }
  0x11   : > { %s2822_s22 = scalar_select %p1800_p9, 1, 0 }
  0x12   : > { %p111_p11 = scmp.lt.s32.totalorder %s1711_s14, 3  ;;  %s124_s25 = sshll.u32 %s2812_s1, 4  ;;  %s125_s25 = int_to_ptr.vmem [resolvable:$true] %s124_s25 }
  0x13   : > { %p1507_p0 = scmp.lt.s32.totalorder %s1711_s14, 2  ;;  %s31_s29 = sadd.s32 1, %s1707_s13 }
  0x14   : > { %p1809_p12 = pnand %p1364_p10, %p111_p11  ;;  %p1830_p6 = scmp.ge.s32.totalorder %s31_s29, 2 }
  0x15   : > { %p1819_p2 = pnand %p1507_p0, %p1786_p5  ;;  %s135_s3 = sand.u32 1, %s1699_s11  }
  0x16   : > { %p1494_p1 = pneg %p1809_p12  ;;  %s1580_s4 = scalar_lea.vmem %s125_s25, 16 }
  0x17   : > { %p1581_p10 = scmp.ne.s32.totalorder %s125_s25, %s1580_s4  ;;  %p1588_p13 = scmp.lt.s32.totalorder %s125_s25, %s125_s25 }
  0x18   : > { %p1825_p4 = pnand %p1494_p1, %p1782_p3  ;;  %p1589_p9 = scmp.lt.s32.totalorder %s1580_s4, %s1580_s4 }
  0x1a   : > { %p1582_p11 = pneg %p1825_p4  ;;  %p1590_p8 = por %p1589_p9, %p1588_p13 }
  0x1c   : > { %p1583_p5 = pnand %p1582_p11, %p1581_p10 }
  0x1e   : > { %p1584_p0 = pneg %p1583_p5 }
  0x20   : > { %p1591_p1 = pnand %p1590_p8, %p1584_p0 }
  0x22   : > { %1594 = shalt.err (!%p1591_p1)
}
  0x23   : > { %s1713_s5 = smov [#allocation9]   ;;  %s2838_s29 = smov (%p1830_p6, %s31_s29), 0 }
  0x24   : > { %1497 = dma.vmem_to_smem (!%p1825_p4), %s125_s25, 16, %s1713_s5, [#allocation8]  }
  0x25   : > { %s1367_s6 = sshll.u32 %s135_s3, 6  ;;  %s35_s7 = ssub.s32 %s1707_s13, %s2838_s29 }
  0x26   : > { %p38_p9 = scmp.eq.s32.totalorder %s35_s7, 0  ;;  %s1484_s8 = sshll.u32 %s1707_s13, 10 }
  0x27   : > { %s1849_s19 = scalar_lea.hbm %s2811_s0, %s1484_s8  ;;  %s139_s23 = scalar_lea.vmem [#allocation5], %s1367_s6 }
  0x28   : > { %s149_s24 = sshll.u32 %s139_s23, 4  ;;  %s1858_s28 = scalar_lea.sflag [#allocation6], %s135_s3  ;;  %s1856_s24 = int_to_ptr.vmem [resolvable:$true] %s149_s24 }
  0x29   : > { %s1854_s25 = scalar_select %p38_p9, %s1699_s11, %s40_s17  }
  0x2a   : > { %s1595_s30 = scalar_lea.hbm %s1849_s19, 1024  ;;  %p1597_p13 = pneg %p1819_p2 }
  0x2b   : > { %p1596_p8 = scmp.ne.s32.totalorder %s1849_s19, %s1595_s30  ;;  %s1600_s6 = scalar_lea.hbm %s2811_s0, 2048 }
  0x2c   : > { %p1601_p10 = scmp.lt.u32.totalorder %s1849_s19, %s2811_s0  ;;  %p1602_p11 = scmp.lt.u32.totalorder %s1600_s6, %s1595_s30 }
  0x2d   : > { %p1598_p4 = pnand %p1597_p13, %p1596_p8  ;;  %p1604_p0 = scmp.lt.u32.totalorder %s1595_s30, %s1849_s19 }
  0x2e   : > { %p1603_p5 = por %p1602_p11, %p1601_p10 }
  0x2f   : > { %p1599_p6 = pneg %p1598_p4 }
  0x30   : > { %p1605_p1 = por %p1604_p0, %p1603_p5 }
  0x32   : > { %p1606_p9 = pnand %p1605_p1, %p1599_p6 }
  0x34   : > { %1609 = shalt.err (!%p1606_p9)
}
  0x35   : > { %s1610_s17 = scalar_lea.vmem %s1856_s24, 1024  ;;  %s1714_s3 = smov [#allocation5]  }
  0x36   : > { %p1611_p8 = scmp.ne.s32.totalorder %s1856_s24, %s1610_s17  ;;  %s1615_s15 = sshll.u32 %s1714_s3, 4  ;;  %s1616_s15 = int_to_ptr.vmem [resolvable:$false] %s1615_s15 }
  0x37   : > { %s1617_s16 = scalar_lea.vmem %s1616_s15, 2048  ;;  %p1618_p7 = scmp.lt.s32.totalorder %s1856_s24, %s1616_s15 }
  0x38   : > { %p1613_p4 = pnand %p1611_p8, %p1597_p13  ;;  %p1619_p10 = scmp.lt.s32.totalorder %s1617_s16, %s1610_s17 }
  0x3a   : > { %p1614_p3 = pneg %p1613_p4  ;;  %p1620_p11 = por %p1619_p10, %p1618_p7 }
  0x3c   : > { %p1621_p5 = pnand %p1620_p11, %p1614_p3 }
  0x3e   : > { %1624 = shalt.err (!%p1621_p5)
}
  0x3f   : > { %s1715_s23 = smov 128   ;;  %s1716_s30 = smov 8  }
  0x40   : > { %1501 = dma.hbm_to_vmem [thread:$0]  (!%p1819_p2), %s1849_s19, 1024, %s1856_s24, %s1858_s28, %s1715_s23, %s1715_s23, %s1716_s30  }
  0x41   : > { %161 = sbr.rel (%p1809_p12) target bundleno = 718 (0x2ce), region = 28  ;;  %s1889_s4 = sand.u32 (!%p1809_p12), 1, %s1695_s10  }
  0x42   : > { %s1371_s5 = sshll.u32 (!%p1809_p12), %s1889_s4, 6  ;;  %s164_s6 = scalar_lea.sflag (!%p1809_p12), [#allocation6], %s1889_s4 }
  0x43   : > { %s1893_s7 = scalar_lea.vmem (!%p1809_p12), [#allocation5], %s1371_s5  ;;  %p2827_p3 = scmp.ne.s32.totalorder (!%p1809_p12), %s2820_s20, 0 }
  0x48   : > { %1678 = dma.done.wait (%p2827_p3), %s164_s6, 1024  }
  0x49   : > { %1680 = vsyncadd (%p2827_p3), %s164_s6, 4294966272  ;;  %p2828_p7 = scmp.ne.s32.totalorder %s2818_s18, 0 }
  0x4b   : > { %1682 = dma.done.wait (%p2828_p7), [#allocation8], 16  }
  0x4c   : > { %1684 = vsyncadd (%p2828_p7), [#allocation8], 4294967280 }
  0x4d   : > { %176 = sfence }
  0x4e   : > { %vm198_vm0 = vcmask 130048   ;;  %v203_v0 = vld [vmem:[%s1893_s7] sm:$0xff]  ;;  %v1374_v1 = vld [vmem:[%s1893_s7 + $0x10] sm:$0xff]  ;;  %v1717_v3 = vmov 0.0   ;;  %v204_v5 = vld [vmem:[%s1893_s7 + $0x8] sm:$0xff]  ;;  %vm252_vm1 = vcmask 23552  }
  0x4f   : > { %v1376_v2 = vld [vmem:[%s1893_s7 + $0x20] sm:$0xff]  ;;  %199 = vst.msk [vmem:[#allocation2] sm:$0xff] %vm198_vm0, %v1717_v3  ;;  %v210_v4 = vadd.f32 %v1374_v1, %v203_v0  ;;  %200 = vst.msk [vmem:[#allocation2 + $0x8] sm:$0xff] %vm198_vm0, %v1717_v3  ;;  %v1375_v6 = vld [vmem:[%s1893_s7 + $0x18] sm:$0xff]  ;;  %vm255_vm2 = vcmask 179352   ;;  %v212_v10 = vmax.f32 %v203_v0, %v1374_v1  ;;  %v1718_v15 = vmov -inf  }
  0x50   : > { %250 = vst [vmem:[#allocation4] sm:$0x7] %v1717_v3  ;;  %251 = vst [vmem:[#allocation4 + $0x13] sm:$0x7] %v1717_v3  ;;  %v1378_v7 = vld [vmem:[%s1893_s7 + $0x30] sm:$0xff]  ;;  %v211_v8 = vadd.f32 %v1375_v6, %v204_v5  ;;  %v1377_v9 = vld [vmem:[%s1893_s7 + $0x28] sm:$0xff]  ;;  %v213_v11 = vmax.f32 %v204_v5, %v1375_v6 }
  0x51   : > { %270 = vst [vmem:[#allocation4 + $0x18] sm:$0x7] %v1717_v3  ;;  %271 = vst [vmem:[#allocation4 + $0x2b] sm:$0x7] %v1717_v3  ;;  %v217_v12 = vadd.f32 %v1376_v2, %v210_v4  ;;  %v1379_v13 = vld [vmem:[%s1893_s7 + $0x38] sm:$0xff]  ;;  %v219_v16 = vmax.f32 %v212_v10, %v1376_v2  ;;  %s1719_s18 = smov 3  }
  0x52   : > { %253 = vst.msk [vmem:[#allocation4 + $0x3] sm:$0xff] %vm252_vm1, %v1717_v3  ;;  %254 = vst.msk [vmem:[#allocation4 + $0xb] sm:$0xff] %vm252_vm1, %v1717_v3  ;;  %v218_v14 = vadd.f32 %v1377_v9, %v211_v8  ;;  %v220_v17 = vmax.f32 %v213_v11, %v1377_v9  ;;  %vm266_vm3 = vcmask 154648   ;;  %s1720_s20 = smov 127   ;;  %s1721_s26 = smov 126  }
  0x53   : > { %272 = vst.msk [vmem:[#allocation4 + $0x1b] sm:$0xff] %vm252_vm1, %v1717_v3  ;;  %273 = vst.msk [vmem:[#allocation4 + $0x23] sm:$0xff] %vm252_vm1, %v1717_v3  ;;  %v224_v18 = vadd.f32 %v1378_v7, %v217_v12  ;;  %v226_v22 = vmax.f32 %v219_v16, %v1378_v7  ;;  %s1722_s27 = smov 125   ;;  %s1723_s19 = smov 124  }
  0x54   : > { %256 = vst.msk [vmem:[#allocation4 + $0x3] sm:$0xff] %vm255_vm2, %v1717_v3  ;;  %257 = vst.msk [vmem:[#allocation4 + $0xb] sm:$0xff] %vm255_vm2, %v1717_v3  ;;  %v225_v19 = vadd.f32 %v1379_v13, %v218_v14  ;;  %v227_v23 = vmax.f32 %v220_v17, %v1379_v13  ;;  %s1724_s24 = smov 123   ;;  %s1725_s28 = smov 122  }
  0x55   : > { %274 = vst.msk [vmem:[#allocation4 + $0x1b] sm:$0xff] %vm255_vm2, %v1717_v3  ;;  %275 = vst.msk [vmem:[#allocation4 + $0x23] sm:$0xff] %vm255_vm2, %v1717_v3  ;;  %s2053_s8 = sld [smem:[#allocation9 + $0x1]]  ;;  %s2055_s17 = sld [smem:[#allocation9]] }
  0x56   : > { %201 = vst.msk [vmem:[#allocation3] sm:$0xff] %vm198_vm0, %v1718_v15  ;;  %202 = vst.msk [vmem:[#allocation3 + $0x8] sm:$0xff] %vm198_vm0, %v1718_v15  ;;  %v228_v20 = vld [vmem:[#allocation2] sm:$0xff]  ;;  %v229_v21 = vld [vmem:[#allocation2 + $0x8] sm:$0xff]  ;;  %s2057_s3 = sld [smem:[#allocation9 + $0x2]]  ;;  %s2063_s15 = sld [smem:[#allocation9 + $0x3]] }
  0x57   : > { %v230_v24 = vadd.f32 %v228_v20, %v224_v18  ;;  %v231_v25 = vadd.f32 %v229_v21, %v225_v19  ;;  %s2065_s16 = sld [smem:[#allocation9 + $0x4]]  ;;  %s2074_s23 = sld [smem:[#allocation9 + $0x5]] }
  0x58   : > { %s2085_s30 = sld [smem:[#allocation9 + $0x6]]  ;;  %s2088_s5 = sld [smem:[#allocation9 + $0x7]] }
  0x59   : > { %233 = vst.msk [vmem:[#allocation2] sm:$0xff] %vm198_vm0, %v230_v24  ;;  %234 = vst.msk [vmem:[#allocation2 + $0x8] sm:$0xff] %vm198_vm0, %v231_v25  ;;  %s2133_s6 = sld [smem:[#allocation9 + $0x8]]  ;;  %s2139_s7 = sld [smem:[#allocation9 + $0x9]] }
  0x5a   : > { %p2829_p2 = scmp.ne.s32.totalorder %s2821_s21, 0 }
  0x5b   : > { %v299_v54 = vstv %s2053_s8  ;;  %v289_v55 = vstv %s2055_s17  ;;  %s2151_s8 = sld [smem:[#allocation9 + $0xb]]  ;;  %s2160_s17 = sld [smem:[#allocation9 + $0xc]] }
  0x5c   : > { %v309_v56 = vstv %s2057_s3  ;;  %v319_v61 = vstv %s2063_s15  ;;  %s2167_s3 = sld [smem:[#allocation9 + $0xd]]  ;;  %s2185_s15 = sld [smem:[#allocation9 + $0xe]] }
  0x5d   : > { %v235_v26 = vld [vmem:[#allocation3] sm:$0xff]  ;;  %v236_v27 = vld [vmem:[#allocation3 + $0x8] sm:$0xff]  ;;  %v329_v1 = vstv %s2065_s16  ;;  %v339_v6 = vstv %s2074_s23  ;;  %s2193_s16 = sld [smem:[#allocation9 + $0xf]]  ;;  %s2199_s23 = sld [smem:[#allocation9 + $0x10]] }
  0x5e   : > { %v237_v28 = vmax.f32 %v235_v26, %v226_v22  ;;  %v238_v29 = vmax.f32 %v236_v27, %v227_v23  ;;  %v349_v17 = vstv %s2085_s30  ;;  %v357_v21 = vstv %s2088_s5  ;;  %s2205_s30 = sld [smem:[#allocation9 + $0x11]]  ;;  %s2210_s5 = sld [smem:[#allocation9 + $0x12]] }
  0x60   : > { %239 = vst.msk [vmem:[#allocation3] sm:$0xff] %vm198_vm0, %v237_v28  ;;  %240 = vst.msk [vmem:[#allocation3 + $0x8] sm:$0xff] %vm198_vm0, %v238_v29  ;;  %v244_v30 = vld [vmem:[#allocation2] sm:$0xff]  ;;  %v245_v31 = vld [vmem:[#allocation2 + $0x8] sm:$0xff] }
  0x61   : > { %v246_v32 = vmul.f32 0.25, %v244_v30  ;;  %v247_v33 = vmul.f32 0.25, %v245_v31 }
  0x63   : > { %260 = vrot.lane.b32.xlu0 %v246_v32, %s1719_s18 }
  0x67   : > { %v248_v34 = vld [vmem:[#allocation3] sm:$0xff]  ;;  %v249_v35 = vld [vmem:[#allocation3 + $0x8] sm:$0xff]  ;;  %262 = vrot.lane.b32.xlu0 %v247_v33, %s1719_s18 }
  0x68   : > { %278 = vrot.lane.b32.xlu1 %v248_v34, %s1719_s18 }
  0x6c   : > { %280 = vrot.lane.b32.xlu1 %v249_v35, %s1719_s18  ;;  %s2145_s18 = sld [smem:[#allocation9 + $0xa]] }
  0xd5   : > { %v261_v36 = vpop.permute.xlu0 %260 }
  0xd6   : > { %267 = vst.msk [vmem:[#allocation4 + $0x3] sm:$0xff] %vm266_vm3, %v261_v36 }
  0xd9   : > { %v263_v38 = vpop.permute.xlu0 %262 }
  0xda   : > { %v279_v37 = vpop.permute.xlu1 %278  ;;  %268 = vst.msk [vmem:[#allocation4 + $0xb] sm:$0xff] %vm266_vm3, %v263_v38 }
  0xdb   : > { %284 = vst.msk [vmem:[#allocation4 + $0x1b] sm:$0xff] %vm266_vm3, %v279_v37 }
  0xdd   : > { %v1919_v40 = vld [vmem:[#allocation4] sm:$0xff] }
  0xde   : > { %v281_v39 = vpop.permute.xlu1 %280  ;;  %295 = vrot.lane.b32.xlu0 %v1919_v40, %s1720_s20  ;;  %v1945_v42 = vld [vmem:[#allocation4 + $0x1] sm:$0xff]  ;;  %v290_v62 = vmul.f32 %v289_v55, %v1919_v40 }
  0xdf   : > { %285 = vst.msk [vmem:[#allocation4 + $0x23] sm:$0xff] %vm266_vm3, %v281_v39  ;;  %v1973_v44 = vld [vmem:[#allocation4 + $0x2] sm:$0xff]  ;;  %v358_v28 = vmul.f32 %v357_v21, %v1945_v42 }
  0xe0   : > { %v2001_v46 = vld [vmem:[#allocation4 + $0x3] sm:$0xff] }
  0xe1   : > { %v1923_v41 = vld [vmem:[#allocation4 + $0x8] sm:$0xff] }
  0xe2   : > { %305 = vrot.lane.b32.xlu0 %v1919_v40, %s1721_s26  ;;  %297 = vrot.lane.b32.xlu1 %v1923_v41, %s1720_s20  ;;  %v1951_v43 = vld [vmem:[#allocation4 + $0x9] sm:$0xff]  ;;  %v291_v7 = vmul.f32 %v289_v55, %v1923_v41 }
  0xe3   : > { %v1979_v45 = vld [vmem:[#allocation4 + $0xa] sm:$0xff]  ;;  %v359_v36 = vmul.f32 %v357_v21, %v1951_v43 }
  0xe4   : > { %v2007_v47 = vld [vmem:[#allocation4 + $0xb] sm:$0xff] }
  0xe5   : > { %v2029_v48 = vld [vmem:[#allocation4 + $0x4] sm:$0xff]  ;;  %v2035_v49 = vld [vmem:[#allocation4 + $0xc] sm:$0xff] }
  0xe6   : > { %315 = vrot.lane.b32.xlu0 %v1919_v40, %s1722_s27  ;;  %307 = vrot.lane.b32.xlu1 %v1923_v41, %s1721_s26  ;;  %v2067_v53 = vld [vmem:[#allocation4 + $0x5] sm:$0xff]  ;;  %v2078_v59 = vld [vmem:[#allocation4 + $0xd] sm:$0xff] }
  0xea   : > { %325 = vrot.lane.b32.xlu0 %v1919_v40, %s1723_s19  ;;  %317 = vrot.lane.b32.xlu1 %v1923_v41, %s1722_s27 }
  0xee   : > { %335 = vrot.lane.b32.xlu0 %v1919_v40, %s1724_s24  ;;  %327 = vrot.lane.b32.xlu1 %v1923_v41, %s1723_s19 }
  0xf2   : > { %345 = vrot.lane.b32.xlu0 %v1919_v40, %s1725_s28  ;;  %337 = vrot.lane.b32.xlu1 %v1923_v41, %s1724_s24  ;;  %v2113_v40 = vld [vmem:[#allocation4 + $0x6] sm:$0xff] }
  0xf6   : > { %363 = vrot.lane.b32.xlu0 %v1945_v42, %s1720_s20  ;;  %347 = vrot.lane.b32.xlu1 %v1923_v41, %s1725_s28 }
  0xfa   : > { %373 = vrot.lane.b32.xlu0 %v1945_v42, %s1721_s26  ;;  %365 = vrot.lane.b32.xlu1 %v1951_v43, %s1720_s20 }
  0xfe   : > { %383 = vrot.lane.b32.xlu0 %v1945_v42, %s1722_s27  ;;  %375 = vrot.lane.b32.xlu1 %v1951_v43, %s1721_s26 }
 0x102   : > { %393 = vrot.lane.b32.xlu0 %v1945_v42, %s1723_s19  ;;  %385 = vrot.lane.b32.xlu1 %v1951_v43, %s1722_s27 }
 0x106   : > { %403 = vrot.lane.b32.xlu0 %v1945_v42, %s1724_s24  ;;  %395 = vrot.lane.b32.xlu1 %v1951_v43, %s1723_s19 }
 0x10a   : > { %413 = vrot.lane.b32.xlu0 %v1945_v42, %s1725_s28  ;;  %405 = vrot.lane.b32.xlu1 %v1951_v43, %s1724_s24 }
 0x10e   : > { %431 = vrot.lane.b32.xlu0 %v1973_v44, %s1720_s20  ;;  %415 = vrot.lane.b32.xlu1 %v1951_v43, %s1725_s28 }
 0x112   : > { %441 = vrot.lane.b32.xlu0 %v1973_v44, %s1721_s26  ;;  %433 = vrot.lane.b32.xlu1 %v1979_v45, %s1720_s20 }
 0x116   : > { %451 = vrot.lane.b32.xlu0 %v1973_v44, %s1722_s27  ;;  %443 = vrot.lane.b32.xlu1 %v1979_v45, %s1721_s26 }
 0x11a   : > { %461 = vrot.lane.b32.xlu0 %v1973_v44, %s1723_s19  ;;  %453 = vrot.lane.b32.xlu1 %v1979_v45, %s1722_s27 }
 0x11e   : > { %471 = vrot.lane.b32.xlu0 %v1973_v44, %s1724_s24  ;;  %463 = vrot.lane.b32.xlu1 %v1979_v45, %s1723_s19 }
 0x122   : > { %481 = vrot.lane.b32.xlu0 %v1973_v44, %s1725_s28  ;;  %473 = vrot.lane.b32.xlu1 %v1979_v45, %s1724_s24 }
 0x126   : > { %499 = vrot.lane.b32.xlu0 %v2001_v46, %s1720_s20  ;;  %483 = vrot.lane.b32.xlu1 %v1979_v45, %s1725_s28 }
 0x12a   : > { %509 = vrot.lane.b32.xlu0 %v2001_v46, %s1721_s26  ;;  %501 = vrot.lane.b32.xlu1 %v2007_v47, %s1720_s20 }
 0x12e   : > { %519 = vrot.lane.b32.xlu0 %v2001_v46, %s1722_s27  ;;  %511 = vrot.lane.b32.xlu1 %v2007_v47, %s1721_s26 }
 0x132   : > { %529 = vrot.lane.b32.xlu0 %v2001_v46, %s1723_s19  ;;  %521 = vrot.lane.b32.xlu1 %v2007_v47, %s1722_s27 }
 0x136   : > { %539 = vrot.lane.b32.xlu0 %v2001_v46, %s1724_s24  ;;  %531 = vrot.lane.b32.xlu1 %v2007_v47, %s1723_s19 }
 0x13a   : > { %549 = vrot.lane.b32.xlu0 %v2001_v46, %s1725_s28  ;;  %541 = vrot.lane.b32.xlu1 %v2007_v47, %s1724_s24 }
 0x13e   : > { %567 = vrot.lane.b32.xlu0 %v2029_v48, %s1720_s20  ;;  %551 = vrot.lane.b32.xlu1 %v2007_v47, %s1725_s28 }
 0x142   : > { %577 = vrot.lane.b32.xlu0 %v2029_v48, %s1721_s26  ;;  %569 = vrot.lane.b32.xlu1 %v2035_v49, %s1720_s20 }
 0x146   : > { %587 = vrot.lane.b32.xlu0 %v2029_v48, %s1722_s27  ;;  %579 = vrot.lane.b32.xlu1 %v2035_v49, %s1721_s26 }
 0x14a   : > { %597 = vrot.lane.b32.xlu0 %v2029_v48, %s1723_s19  ;;  %589 = vrot.lane.b32.xlu1 %v2035_v49, %s1722_s27 }
 0x14e   : > { %607 = vrot.lane.b32.xlu0 %v2029_v48, %s1724_s24  ;;  %599 = vrot.lane.b32.xlu1 %v2035_v49, %s1723_s19 }
 0x150   : > { %v296_v50 = vpop.permute.xlu0 %295 }
 0x151   : > { %v300_v60 = vmul.f32 %v299_v54, %v296_v50 }
 0x152   : > { %617 = vrot.lane.b32.xlu0 %v2029_v48, %s1725_s28  ;;  %609 = vrot.lane.b32.xlu1 %v2035_v49, %s1724_s24 }
 0x153   : > { %v302_v3 = vadd.f32 %v300_v60, %v290_v62 }
 0x154   : > { %v298_v51 = vpop.permute.xlu1 %297  ;;  %v306_v52 = vpop.permute.xlu0 %305 }
 0x155   : > { %v310_v63 = vmul.f32 %v309_v56, %v306_v52  ;;  %v301_v4 = vmul.f32 %v299_v54, %v298_v51  ;;  %v2119_v51 = vld [vmem:[#allocation4 + $0xe] sm:$0xff] }
 0x156   : > { %635 = vrot.lane.b32.xlu0 %v2067_v53, %s1720_s20  ;;  %619 = vrot.lane.b32.xlu1 %v2035_v49, %s1725_s28 }
 0x157   : > { %v312_v8 = vadd.f32 %v310_v63, %v302_v3  ;;  %v303_v13 = vadd.f32 %v301_v4, %v291_v7  ;;  %v2157_v63 = vld [vmem:[#allocation4 + $0x18] sm:$0xff] }
 0x158   : > { %v308_v57 = vpop.permute.xlu1 %307  ;;  %v316_v58 = vpop.permute.xlu0 %315 }
 0x159   : > { %v320_v5 = vmul.f32 %v319_v61, %v316_v58  ;;  %v311_v9 = vmul.f32 %v309_v56, %v308_v57 }
 0x15a   : > { %645 = vrot.lane.b32.xlu0 %v2067_v53, %s1721_s26  ;;  %637 = vrot.lane.b32.xlu1 %v2078_v59, %s1720_s20 }
 0x15b   : > { %v322_v14 = vadd.f32 %v320_v5, %v312_v8  ;;  %v313_v18 = vadd.f32 %v311_v9, %v303_v13  ;;  %v2173_v5 = vld [vmem:[#allocation4 + $0x20] sm:$0xff]  ;;  %v397_v8 = vstv %s2151_s8  ;;  %s2257_s8 = sld [smem:[#allocation9 + $0x16]] }
 0x15c   : > { %v318_v0 = vpop.permute.xlu1 %317  ;;  %v326_v2 = vpop.permute.xlu0 %325 }
 0x15d   : > { %v330_v10 = vmul.f32 %v329_v1, %v326_v2  ;;  %v321_v15 = vmul.f32 %v319_v61, %v318_v0  ;;  %v367_v0 = vstv %s2133_s6  ;;  %s2218_s6 = sld [smem:[#allocation9 + $0x13]] }
 0x15e   : > { %655 = vrot.lane.b32.xlu0 %v2067_v53, %s1722_s27  ;;  %647 = vrot.lane.b32.xlu1 %v2078_v59, %s1721_s26 }
 0x15f   : > { %v332_v19 = vadd.f32 %v330_v10, %v322_v14  ;;  %v323_v24 = vadd.f32 %v321_v15, %v313_v18  ;;  %v407_v14 = vstv %s2160_s17  ;;  %v417_v18 = vstv %s2167_s3  ;;  %s2265_s17 = sld [smem:[#allocation9 + $0x17]]  ;;  %s2268_s3 = sld [smem:[#allocation9 + $0x18]] }
 0x160   : > { %v328_v11 = vpop.permute.xlu1 %327  ;;  %v336_v12 = vpop.permute.xlu0 %335 }
 0x161   : > { %v340_v16 = vmul.f32 %v339_v6, %v336_v12  ;;  %v331_v20 = vmul.f32 %v329_v1, %v328_v11  ;;  %v377_v1 = vstv %s2139_s7  ;;  %s2224_s7 = sld [smem:[#allocation9 + $0x14]] }
 0x162   : > { %665 = vrot.lane.b32.xlu0 %v2067_v53, %s1723_s19  ;;  %657 = vrot.lane.b32.xlu1 %v2078_v59, %s1722_s27 }
 0x163   : > { %v342_v25 = vadd.f32 %v340_v16, %v332_v19  ;;  %v333_v29 = vadd.f32 %v331_v20, %v323_v24 }
 0x164   : > { %v338_v22 = vpop.permute.xlu1 %337  ;;  %v346_v23 = vpop.permute.xlu0 %345 }
 0x165   : > { %v341_v26 = vmul.f32 %v339_v6, %v338_v22  ;;  %v350_v27 = vmul.f32 %v349_v17, %v346_v23  ;;  %v387_v6 = vstv %s2145_s18  ;;  %s2247_s18 = sld [smem:[#allocation9 + $0x15]] }
 0x166   : > { %675 = vrot.lane.b32.xlu0 %v2067_v53, %s1724_s24  ;;  %667 = vrot.lane.b32.xlu1 %v2078_v59, %s1723_s19 }
 0x167   : > { %v352_v30 = vadd.f32 %v350_v27, %v342_v25  ;;  %v343_v33 = vadd.f32 %v341_v26, %v333_v29 }
 0x168   : > { %v348_v31 = vpop.permute.xlu1 %347  ;;  %v364_v32 = vpop.permute.xlu0 %363 }
 0x169   : > { %v360_v34 = vadd.f32 %v358_v28, %v352_v30  ;;  %v351_v35 = vmul.f32 %v349_v17, %v348_v31  ;;  %v368_v4 = vmul.f32 %v367_v0, %v364_v32 }
 0x16a   : > { %685 = vrot.lane.b32.xlu0 %v2067_v53, %s1725_s28  ;;  %677 = vrot.lane.b32.xlu1 %v2078_v59, %s1724_s24 }
 0x16b   : > { %v353_v37 = vadd.f32 %v351_v35, %v343_v33  ;;  %v370_v11 = vadd.f32 %v368_v4, %v360_v34  ;;  %v425_v34 = vstv %s2185_s15  ;;  %v465_v4 = vstv %s2210_s5  ;;  %s2276_s15 = sld [smem:[#allocation9 + $0x19]]  ;;  %s2308_s5 = sld [smem:[#allocation9 + $0x1d]] }
 0x16c   : > { %v366_v38 = vpop.permute.xlu1 %365  ;;  %v374_v39 = vpop.permute.xlu0 %373 }
 0x16d   : > { %v361_v41 = vadd.f32 %v359_v36, %v353_v37  ;;  %v378_v7 = vmul.f32 %v377_v1, %v374_v39  ;;  %v369_v12 = vmul.f32 %v367_v0, %v366_v38  ;;  %v435_v38 = vstv %s2193_s16  ;;  %s2279_s16 = sld [smem:[#allocation9 + $0x1a]] }
 0x16e   : > { %703 = vrot.lane.b32.xlu0 %v2113_v40, %s1720_s20  ;;  %687 = vrot.lane.b32.xlu1 %v2078_v59, %s1725_s28 }
 0x16f   : > { %v380_v15 = vadd.f32 %v378_v7, %v370_v11  ;;  %v371_v21 = vadd.f32 %v369_v12, %v361_v41 }
 0x170   : > { %v376_v42 = vpop.permute.xlu1 %375  ;;  %v384_v50 = vpop.permute.xlu0 %383 }
 0x171   : > { %v388_v13 = vmul.f32 %v387_v6, %v384_v50  ;;  %v379_v16 = vmul.f32 %v377_v1, %v376_v42  ;;  %v426_v42 = vmul.f32 %v425_v34, %v1973_v44  ;;  %v427_v44 = vmul.f32 %v425_v34, %v1979_v45  ;;  %v2238_v1 = vld [vmem:[#allocation4 + $0x19] sm:$0xff] }
 0x172   : > { %713 = vrot.lane.b32.xlu0 %v2113_v40, %s1721_s26  ;;  %705 = vrot.lane.b32.xlu1 %v2119_v51, %s1720_s20  ;;  %v475_v45 = vstv %s2218_s6  ;;  %v513_v34 = vstv %s2265_s17  ;;  %s2312_s6 = sld [smem:[#allocation9 + $0x1e]]  ;;  %s2338_s17 = sld [smem:[#allocation9 + $0x22]] }
 0x173   : > { %v390_v22 = vadd.f32 %v388_v13, %v380_v15  ;;  %v381_v25 = vadd.f32 %v379_v16, %v371_v21  ;;  %v2254_v15 = vld [vmem:[#allocation4 + $0x21] sm:$0xff]  ;;  %v485_v16 = vstv %s2224_s7  ;;  %s2318_s7 = sld [smem:[#allocation9 + $0x1f]] }
 0x174   : > { %v386_v43 = vpop.permute.xlu1 %385  ;;  %v394_v52 = vpop.permute.xlu0 %393 }
 0x175   : > { %v398_v17 = vmul.f32 %v397_v8, %v394_v52  ;;  %v389_v23 = vmul.f32 %v387_v6, %v386_v43  ;;  %v445_v43 = vstv %s2199_s23  ;;  %s2287_s23 = sld [smem:[#allocation9 + $0x1b]] }
 0x176   : > { %723 = vrot.lane.b32.xlu0 %v2113_v40, %s1722_s27  ;;  %715 = vrot.lane.b32.xlu1 %v2119_v51, %s1721_s26 }
 0x177   : > { %v400_v26 = vadd.f32 %v398_v17, %v390_v22  ;;  %v391_v31 = vadd.f32 %v389_v23, %v381_v25 }
 0x178   : > { %v396_v54 = vpop.permute.xlu1 %395  ;;  %v404_v55 = vpop.permute.xlu0 %403 }
 0x179   : > { %v408_v24 = vmul.f32 %v407_v14, %v404_v55  ;;  %v399_v27 = vmul.f32 %v397_v8, %v396_v54 }
 0x17a   : > { %733 = vrot.lane.b32.xlu0 %v2113_v40, %s1723_s19  ;;  %725 = vrot.lane.b32.xlu1 %v2119_v51, %s1722_s27 }
 0x17b   : > { %v410_v32 = vadd.f32 %v408_v24, %v400_v26  ;;  %v401_v35 = vadd.f32 %v399_v27, %v391_v31  ;;  %v493_v26 = vstv %s2247_s18  ;;  %s2327_s18 = sld [smem:[#allocation9 + $0x20]] }
 0x17c   : > { %v406_v56 = vpop.permute.xlu1 %405  ;;  %v414_v57 = vpop.permute.xlu0 %413 }
 0x17d   : > { %v418_v28 = vmul.f32 %v417_v18, %v414_v57  ;;  %v409_v33 = vmul.f32 %v407_v14, %v406_v56  ;;  %v455_v56 = vstv %s2205_s30  ;;  %s2299_s30 = sld [smem:[#allocation9 + $0x1c]] }
 0x17e   : > { %743 = vrot.lane.b32.xlu0 %v2113_v40, %s1724_s24  ;;  %735 = vrot.lane.b32.xlu1 %v2119_v51, %s1723_s19 }
 0x17f   : > { %v420_v36 = vadd.f32 %v418_v28, %v410_v32  ;;  %v411_v50 = vadd.f32 %v409_v33, %v401_v35  ;;  %v503_v32 = vstv %s2257_s8  ;;  %s2330_s8 = sld [smem:[#allocation9 + $0x21]] }
 0x180   : > { %v2141_v58 = vpop.permute.xlu1 %415  ;;  %v2143_v60 = vpop.permute.xlu0 %431 }
 0x181   : > { %v419_v37 = vmul.f32 %v417_v18, %v2141_v58  ;;  %v428_v52 = vadd.f32 %v426_v42, %v420_v36  ;;  %v436_v55 = vmul.f32 %v435_v38, %v2143_v60  ;;  %v523_v42 = vstv %s2268_s3  ;;  %s2347_s3 = sld [smem:[#allocation9 + $0x23]] }
 0x182   : > { %753 = vrot.lane.b32.xlu0 %v2113_v40, %s1725_s28  ;;  %745 = vrot.lane.b32.xlu1 %v2119_v51, %s1724_s24 }
 0x183   : > { %v421_v54 = vadd.f32 %v419_v37, %v411_v50  ;;  %v438_v6 = vadd.f32 %v436_v55, %v428_v52 }
 0x184   : > { %v2153_v61 = vpop.permute.xlu1 %433  ;;  %v2155_v62 = vpop.permute.xlu0 %441 }
 0x185   : > { %v446_v0 = vmul.f32 %v445_v43, %v2155_v62  ;;  %v429_v60 = vadd.f32 %v427_v44, %v421_v54  ;;  %v437_v7 = vmul.f32 %v435_v38, %v2153_v61 }
 0x186   : > { %771 = vrot.lane.b32.xlu0 %v2157_v63, %s1720_s20  ;;  %755 = vrot.lane.b32.xlu1 %v2119_v51, %s1725_s28 }
 0x187   : > { %v448_v12 = vadd.f32 %v446_v0, %v438_v6  ;;  %v439_v61 = vadd.f32 %v437_v7, %v429_v60  ;;  %v543_v0 = vstv %s2279_s16  ;;  %v553_v60 = vstv %s2287_s23  ;;  %s2357_s16 = sld [smem:[#allocation9 + $0x25]]  ;;  %s2363_s23 = sld [smem:[#allocation9 + $0x26]] }
 0x188   : > { %v2169_v2 = vpop.permute.xlu1 %443  ;;  %v2171_v3 = vpop.permute.xlu0 %451 }
 0x189   : > { %v456_v8 = vmul.f32 %v455_v56, %v2171_v3  ;;  %v447_v13 = vmul.f32 %v445_v43, %v2169_v2  ;;  %v533_v43 = vstv %s2276_s15  ;;  %s2355_s15 = sld [smem:[#allocation9 + $0x24]] }
 0x18a   : > { %781 = vrot.lane.b32.xlu0 %v2157_v63, %s1721_s26  ;;  %773 = vrot.lane.b32.xlu1 %v2173_v5, %s1720_s20 }
 0x18b   : > { %v458_v3 = vadd.f32 %v456_v8, %v448_v12  ;;  %v449_v21 = vadd.f32 %v447_v13, %v439_v61  ;;  %v2310_v12 = vld [vmem:[#allocation4 + $0x1a] sm:$0xff] }
 0x18c   : > { %v2181_v9 = vpop.permute.xlu1 %453  ;;  %v2183_v10 = vpop.permute.xlu0 %461 }
 0x18d   : > { %v466_v14 = vmul.f32 %v465_v4, %v2183_v10  ;;  %v457_v17 = vmul.f32 %v455_v56, %v2181_v9 }
 0x18e   : > { %791 = vrot.lane.b32.xlu0 %v2157_v63, %s1722_s27  ;;  %783 = vrot.lane.b32.xlu1 %v2173_v5, %s1721_s26 }
 0x18f   : > { %v468_v22 = vadd.f32 %v466_v14, %v458_v3  ;;  %v459_v9 = vadd.f32 %v457_v17, %v449_v21  ;;  %v561_v21 = vstv %s2299_s30  ;;  %s2366_s30 = sld [smem:[#allocation9 + $0x27]] }
 0x190   : > { %v2195_v19 = vpop.permute.xlu1 %463  ;;  %v2197_v20 = vpop.permute.xlu0 %471 }
 0x191   : > { %v476_v2 = vmul.f32 %v475_v45, %v2197_v20  ;;  %v467_v23 = vmul.f32 %v465_v4, %v2195_v19 }
 0x192   : > { %801 = vrot.lane.b32.xlu0 %v2157_v63, %s1723_s19  ;;  %793 = vrot.lane.b32.xlu1 %v2173_v5, %s1722_s27 }
 0x193   : > { %v478_v20 = vadd.f32 %v476_v2, %v468_v22  ;;  %v469_v19 = vadd.f32 %v467_v23, %v459_v9  ;;  %v571_v9 = vstv %s2308_s5  ;;  %s2375_s5 = sld [smem:[#allocation9 + $0x28]] }
 0x194   : > { %v2207_v29 = vpop.permute.xlu1 %473  ;;  %v482_v30 = vpop.permute.xlu0 %481 }
 0x195   : > { %v486_v24 = vmul.f32 %v485_v16, %v482_v30  ;;  %v477_v25 = vmul.f32 %v475_v45, %v2207_v29  ;;  %v494_v29 = vmul.f32 %v493_v26, %v2001_v46  ;;  %v495_v46 = vmul.f32 %v493_v26, %v2007_v47 }
 0x196   : > { %811 = vrot.lane.b32.xlu0 %v2157_v63, %s1724_s24  ;;  %803 = vrot.lane.b32.xlu1 %v2173_v5, %s1723_s19  ;;  %v562_v26 = vmul.f32 %v561_v21, %v2029_v48 }
 0x197   : > { %v488_v30 = vadd.f32 %v486_v24, %v478_v20  ;;  %v479_v33 = vadd.f32 %v477_v25, %v469_v19 }
 0x198   : > { %v484_v39 = vpop.permute.xlu1 %483  ;;  %v2220_v41 = vpop.permute.xlu0 %499 }
 0x199   : > { %v487_v31 = vmul.f32 %v485_v16, %v484_v39  ;;  %v496_v37 = vadd.f32 %v494_v29, %v488_v30  ;;  %v504_v39 = vmul.f32 %v503_v32, %v2220_v41 }
 0x19a   : > { %821 = vrot.lane.b32.xlu0 %v2157_v63, %s1725_s28  ;;  %813 = vrot.lane.b32.xlu1 %v2173_v5, %s1724_s24 }
 0x19b   : > { %v489_v38 = vadd.f32 %v487_v31, %v479_v33  ;;  %v506_v56 = vadd.f32 %v504_v39, %v496_v37 }
 0x19c   : > { %v2232_v57 = vpop.permute.xlu1 %501  ;;  %v2234_v58 = vpop.permute.xlu0 %509 }
 0x19d   : > { %v514_v50 = vmul.f32 %v513_v34, %v2234_v58  ;;  %v497_v55 = vadd.f32 %v495_v46, %v489_v38  ;;  %v505_v44 = vmul.f32 %v503_v32, %v2232_v57  ;;  %v591_v32 = vstv %s2318_s7  ;;  %s2389_s7 = sld [smem:[#allocation9 + $0x2a]] }
 0x19e   : > { %839 = vrot.lane.b32.xlu0 %v2238_v1, %s1720_s20  ;;  %823 = vrot.lane.b32.xlu1 %v2173_v5, %s1725_s28 }
 0x19f   : > { %v516_v47 = vadd.f32 %v514_v50, %v506_v56  ;;  %v507_v57 = vadd.f32 %v505_v44, %v497_v55 }
 0x1a0   : > { %v2250_v62 = vpop.permute.xlu1 %511  ;;  %v520_v11 = vpop.permute.xlu0 %519 }
 0x1a1   : > { %v524_v41 = vmul.f32 %v523_v42, %v520_v11  ;;  %v515_v58 = vmul.f32 %v513_v34, %v2250_v62  ;;  %v563_v34 = vmul.f32 %v561_v21, %v2035_v49 }
 0x1a2   : > { %841 = vrot.lane.b32.xlu1 %v2254_v15, %s1720_s20  ;;  %849 = vrot.lane.b32.xlu0 %v2238_v1, %s1721_s26 }
 0x1a3   : > { %v526_v8 = vadd.f32 %v524_v41, %v516_v47  ;;  %v517_v62 = vadd.f32 %v515_v58, %v507_v57 }
 0x1a4   : > { %v522_v10 = vpop.permute.xlu1 %521  ;;  %v530_v18 = vpop.permute.xlu0 %529 }
 0x1a5   : > { %v534_v4 = vmul.f32 %v533_v43, %v530_v18  ;;  %v525_v45 = vmul.f32 %v523_v42, %v522_v10  ;;  %v2320_v18 = vld [vmem:[#allocation4 + $0x22] sm:$0xff]  ;;  %v611_v42 = vstv %s2330_s8  ;;  %s2404_s8 = sld [smem:[#allocation9 + $0x2c]] }
 0x1a6   : > { %851 = vrot.lane.b32.xlu1 %v2254_v15, %s1721_s26  ;;  %859 = vrot.lane.b32.xlu0 %v2238_v1, %s1722_s27 }
 0x1a7   : > { %v536_v13 = vadd.f32 %v534_v4, %v526_v8  ;;  %v527_v17 = vadd.f32 %v525_v45, %v517_v62  ;;  %v629_v45 = vstv %s2347_s3  ;;  %s2420_s3 = sld [smem:[#allocation9 + $0x2e]] }
 0x1a8   : > { %v532_v27 = vpop.permute.xlu1 %531  ;;  %v540_v28 = vpop.permute.xlu0 %539 }
 0x1a9   : > { %v544_v11 = vmul.f32 %v543_v0, %v540_v28  ;;  %v535_v14 = vmul.f32 %v533_v43, %v532_v27  ;;  %v581_v28 = vstv %s2312_s6  ;;  %s2386_s6 = sld [smem:[#allocation9 + $0x29]] }
 0x1aa   : > { %861 = vrot.lane.b32.xlu1 %v2254_v15, %s1722_s27  ;;  %869 = vrot.lane.b32.xlu0 %v2238_v1, %s1723_s19 }
 0x1ab   : > { %v546_v2 = vadd.f32 %v544_v11, %v536_v13  ;;  %v537_v22 = vadd.f32 %v535_v14, %v527_v17  ;;  %v630_v17 = vmul.f32 %v629_v45, %v2067_v53  ;;  %v631_v53 = vmul.f32 %v629_v45, %v2078_v59 }
 0x1ac   : > { %v542_v35 = vpop.permute.xlu1 %541  ;;  %v550_v36 = vpop.permute.xlu0 %549 }
 0x1ad   : > { %v554_v16 = vmul.f32 %v553_v60, %v550_v36  ;;  %v545_v10 = vmul.f32 %v543_v0, %v542_v35  ;;  %v601_v35 = vstv %s2327_s18  ;;  %s2397_s18 = sld [smem:[#allocation9 + $0x2b]] }
 0x1ae   : > { %871 = vrot.lane.b32.xlu1 %v2254_v15, %s1723_s19  ;;  %879 = vrot.lane.b32.xlu0 %v2238_v1, %s1724_s24 }
 0x1af   : > { %v556_v23 = vadd.f32 %v554_v16, %v546_v2  ;;  %v547_v27 = vadd.f32 %v545_v10, %v537_v22  ;;  %v649_v10 = vstv %s2357_s16  ;;  %s2439_s16 = sld [smem:[#allocation9 + $0x30]] }
 0x1b0   : > { %v552_v52 = vpop.permute.xlu1 %551  ;;  %v568_v54 = vpop.permute.xlu0 %567 }
 0x1b1   : > { %v555_v24 = vmul.f32 %v553_v60, %v552_v52  ;;  %v564_v19 = vadd.f32 %v562_v26, %v556_v23  ;;  %v572_v31 = vmul.f32 %v571_v9, %v568_v54  ;;  %v621_v54 = vstv %s2338_s17  ;;  %s2412_s17 = sld [smem:[#allocation9 + $0x2d]] }
 0x1b2   : > { %881 = vrot.lane.b32.xlu1 %v2254_v15, %s1724_s24  ;;  %889 = vrot.lane.b32.xlu0 %v2238_v1, %s1725_s28 }
 0x1b3   : > { %v557_v30 = vadd.f32 %v555_v24, %v547_v27  ;;  %v574_v37 = vadd.f32 %v572_v31, %v564_v19 }
 0x1b4   : > { %v570_v6 = vpop.permute.xlu1 %569  ;;  %v578_v7 = vpop.permute.xlu0 %577 }
 0x1b5   : > { %v582_v48 = vmul.f32 %v581_v28, %v578_v7  ;;  %v565_v36 = vadd.f32 %v563_v34, %v557_v30  ;;  %v573_v38 = vmul.f32 %v571_v9, %v570_v6 }
 0x1b6   : > { %891 = vrot.lane.b32.xlu1 %v2254_v15, %s1725_s28  ;;  %907 = vrot.lane.b32.xlu0 %v2310_v12, %s1720_s20 }
 0x1b7   : > { %v584_v43 = vadd.f32 %v582_v48, %v574_v37  ;;  %v575_v55 = vadd.f32 %v573_v38, %v565_v36 }
 0x1b8   : > { %v580_v61 = vpop.permute.xlu1 %579  ;;  %v588_v3 = vpop.permute.xlu0 %587 }
 0x1b9   : > { %v592_v39 = vmul.f32 %v591_v32, %v588_v3  ;;  %v583_v49 = vmul.f32 %v581_v28, %v580_v61  ;;  %v2368_v61 = vld [vmem:[#allocation4 + $0x1b] sm:$0xff]  ;;  %v639_v3 = vstv %s2355_s15  ;;  %v669_v28 = vstv %s2366_s30  ;;  %s2430_s15 = sld [smem:[#allocation9 + $0x2f]]  ;;  %s2448_s30 = sld [smem:[#allocation9 + $0x32]] }
 0x1ba   : > { %909 = vrot.lane.b32.xlu1 %v2320_v18, %s1720_s20  ;;  %917 = vrot.lane.b32.xlu0 %v2310_v12, %s1721_s26 }
 0x1bb   : > { %v594_v56 = vadd.f32 %v592_v39, %v584_v43  ;;  %v585_v58 = vadd.f32 %v583_v49, %v575_v55 }
 0x1bc   : > { %v590_v20 = vpop.permute.xlu1 %589  ;;  %v598_v25 = vpop.permute.xlu0 %597 }
 0x1bd   : > { %v602_v52 = vmul.f32 %v601_v35, %v598_v25  ;;  %v593_v44 = vmul.f32 %v591_v32, %v590_v20  ;;  %v2379_v20 = vld [vmem:[#allocation4 + $0x23] sm:$0xff]  ;;  %v659_v25 = vstv %s2363_s23  ;;  %s2441_s23 = sld [smem:[#allocation9 + $0x31]] }
 0x1be   : > { %919 = vrot.lane.b32.xlu1 %v2320_v18, %s1721_s26  ;;  %927 = vrot.lane.b32.xlu0 %v2310_v12, %s1722_s27 }
 0x1bf   : > { %v604_v4 = vadd.f32 %v602_v52, %v594_v56  ;;  %v595_v7 = vadd.f32 %v593_v44, %v585_v58  ;;  %v697_v52 = vstv %s2389_s7  ;;  %s2471_s7 = sld [smem:[#allocation9 + $0x35]] }
 0x1c0   : > { %v600_v29 = vpop.permute.xlu1 %599  ;;  %v608_v33 = vpop.permute.xlu0 %607  ;;  %v698_v58 = vmul.f32 %v697_v52, %v2113_v40  ;;  %v699_v40 = vmul.f32 %v697_v52, %v2119_v51 }
 0x1c1   : > { %v612_v41 = vmul.f32 %v611_v42, %v608_v33  ;;  %v603_v60 = vmul.f32 %v601_v35, %v600_v29  ;;  %v679_v33 = vstv %s2375_s5  ;;  %s2455_s5 = sld [smem:[#allocation9 + $0x33]] }
 0x1c2   : > { %929 = vrot.lane.b32.xlu1 %v2320_v18, %s1722_s27  ;;  %937 = vrot.lane.b32.xlu0 %v2310_v12, %s1723_s19 }
 0x1c3   : > { %v614_v57 = vadd.f32 %v612_v41, %v604_v4  ;;  %v605_v13 = vadd.f32 %v603_v60, %v595_v7 }
 0x1c4   : > { %v610_v46 = vpop.permute.xlu1 %609  ;;  %v618_v50 = vpop.permute.xlu0 %617 }
 0x1c5   : > { %v622_v6 = vmul.f32 %v621_v54, %v618_v50  ;;  %v613_v8 = vmul.f32 %v611_v42, %v610_v46  ;;  %v689_v46 = vstv %s2386_s6  ;;  %s2463_s6 = sld [smem:[#allocation9 + $0x34]] }
 0x1c6   : > { %939 = vrot.lane.b32.xlu1 %v2320_v18, %s1723_s19  ;;  %947 = vrot.lane.b32.xlu0 %v2310_v12, %s1724_s24 }
 0x1c7   : > { %v624_v14 = vadd.f32 %v622_v6, %v614_v57  ;;  %v615_v2 = vadd.f32 %v613_v8, %v605_v13 }
 0x1c8   : > { %v620_v0 = vpop.permute.xlu1 %619  ;;  %v636_v47 = vpop.permute.xlu0 %635 }
 0x1c9   : > { %v623_v16 = vmul.f32 %v621_v54, %v620_v0  ;;  %v632_v23 = vadd.f32 %v630_v17, %v624_v14  ;;  %v640_v9 = vmul.f32 %v639_v3, %v636_v47  ;;  %v707_v47 = vstv %s2397_s18  ;;  %s1433_s18 = sld [smem:[#allocation9 + $0x36]] }
 0x1ca   : > { %949 = vrot.lane.b32.xlu1 %v2320_v18, %s1724_s24  ;;  %957 = vrot.lane.b32.xlu0 %v2310_v12, %s1725_s28 }
 0x1cb   : > { %v625_v24 = vadd.f32 %v623_v16, %v615_v2  ;;  %v642_v31 = vadd.f32 %v640_v9, %v632_v23 }
 0x1cc   : > { %v638_v11 = vpop.permute.xlu1 %637  ;;  %v646_v62 = vpop.permute.xlu0 %645 }
 0x1cd   : > { %v650_v26 = vmul.f32 %v649_v10, %v646_v62  ;;  %v633_v30 = vadd.f32 %v631_v53, %v625_v24  ;;  %v641_v32 = vmul.f32 %v639_v3, %v638_v11  ;;  %v717_v62 = vstv %s2404_s8  ;;  %s2571_s8 = sld [smem:[#allocation9 + $0x3c]] }
 0x1ce   : > { %959 = vrot.lane.b32.xlu1 %v2320_v18, %s1725_s28  ;;  %975 = vrot.lane.b32.xlu0 %v2368_v61, %s1720_s20 }
 0x1cf   : > { %v652_v59 = vadd.f32 %v650_v26, %v642_v31  ;;  %v643_v37 = vadd.f32 %v641_v32, %v633_v30  ;;  %v2432_v26 = vld [vmem:[#allocation4 + $0x24] sm:$0xff] }
 0x1d0   : > { %v648_v21 = vpop.permute.xlu1 %647  ;;  %v656_v22 = vpop.permute.xlu0 %655 }
 0x1d1   : > { %v660_v29 = vmul.f32 %v659_v25, %v656_v22  ;;  %v651_v34 = vmul.f32 %v649_v10, %v648_v21  ;;  %v2423_v21 = vld [vmem:[#allocation4 + $0x1c] sm:$0xff]  ;;  %v727_v22 = vstv %s2412_s17  ;;  %s2574_s17 = sld [smem:[#allocation9 + $0x3d]] }
 0x1d2   : > { %977 = vrot.lane.b32.xlu1 %v2379_v20, %s1720_s20  ;;  %985 = vrot.lane.b32.xlu0 %v2368_v61, %s1721_s26 }
 0x1d3   : > { %v662_v38 = vadd.f32 %v660_v29, %v652_v59  ;;  %v653_v50 = vadd.f32 %v651_v34, %v643_v37 }
 0x1d4   : > { %v658_v27 = vpop.permute.xlu1 %657  ;;  %v666_v19 = vpop.permute.xlu0 %665 }
 0x1d5   : > { %v670_v48 = vmul.f32 %v669_v28, %v666_v19  ;;  %v661_v39 = vmul.f32 %v659_v25, %v658_v27  ;;  %v737_v27 = vstv %s2420_s3  ;;  %s2593_s3 = sld [smem:[#allocation9 + $0x3f]] }
 0x1d6   : > { %987 = vrot.lane.b32.xlu1 %v2379_v20, %s1721_s26  ;;  %995 = vrot.lane.b32.xlu0 %v2368_v61, %s1722_s27 }
 0x1d7   : > { %v672_v43 = vadd.f32 %v670_v48, %v662_v38  ;;  %v663_v56 = vadd.f32 %v661_v39, %v653_v50  ;;  %v757_v38 = vstv %s2439_s16  ;;  %v765_v50 = vstv %s2441_s23  ;;  %s2606_s16 = sld [smem:[#allocation9 + $0x41]]  ;;  %s2614_s23 = sld [smem:[#allocation9 + $0x42]] }
 0x1d8   : > { %v668_v35 = vpop.permute.xlu1 %667  ;;  %v676_v36 = vpop.permute.xlu0 %675 }
 0x1d9   : > { %v680_v42 = vmul.f32 %v679_v33, %v676_v36  ;;  %v671_v49 = vmul.f32 %v669_v28, %v668_v35 }
 0x1da   : > { %997 = vrot.lane.b32.xlu1 %v2379_v20, %s1722_s27  ;;  %1005 = vrot.lane.b32.xlu0 %v2368_v61, %s1723_s19 }
 0x1db   : > { %v682_v44 = vadd.f32 %v680_v42, %v672_v43  ;;  %v673_v4 = vadd.f32 %v671_v49, %v663_v56  ;;  %v766_v56 = vmul.f32 %v765_v50, %v2157_v63 }
 0x1dc   : > { %v678_v54 = vpop.permute.xlu1 %677  ;;  %v686_v55 = vpop.permute.xlu0 %685 }
 0x1dd   : > { %v681_v41 = vmul.f32 %v679_v33, %v678_v54  ;;  %v690_v0 = vmul.f32 %v689_v46, %v686_v55  ;;  %v747_v33 = vstv %s2430_s15  ;;  %v775_v54 = vstv %s2448_s30  ;;  %s2602_s15 = sld [smem:[#allocation9 + $0x40]]  ;;  %s2618_s30 = sld [smem:[#allocation9 + $0x43]] }
 0x1de   : > { %1007 = vrot.lane.b32.xlu1 %v2379_v20, %s1723_s19  ;;  %1015 = vrot.lane.b32.xlu0 %v2368_v61, %s1724_s24 }
 0x1df   : > { %v692_v60 = vadd.f32 %v690_v0, %v682_v44  ;;  %v683_v57 = vadd.f32 %v681_v41, %v673_v4 }
 0x1e0   : > { %v688_v6 = vpop.permute.xlu1 %687  ;;  %v704_v7 = vpop.permute.xlu0 %703 }
 0x1e1   : > { %v700_v8 = vadd.f32 %v698_v58, %v692_v60  ;;  %v691_v45 = vmul.f32 %v689_v46, %v688_v6  ;;  %v708_v11 = vmul.f32 %v707_v47, %v704_v7  ;;  %v785_v60 = vstv %s2455_s5  ;;  %s2626_s5 = sld [smem:[#allocation9 + $0x44]] }
 0x1e2   : > { %1017 = vrot.lane.b32.xlu1 %v2379_v20, %s1724_s24  ;;  %1025 = vrot.lane.b32.xlu0 %v2368_v61, %s1725_s28  ;;  %v767_v6 = vmul.f32 %v765_v50, %v2173_v5 }
 0x1e3   : > { %v693_v13 = vadd.f32 %v691_v45, %v683_v57  ;;  %v710_v14 = vadd.f32 %v708_v11, %v700_v8 }
 0x1e4   : > { %v706_v16 = vpop.permute.xlu1 %705  ;;  %v714_v3 = vpop.permute.xlu0 %713 }
 0x1e5   : > { %v701_v17 = vadd.f32 %v699_v40, %v693_v13  ;;  %v709_v2 = vmul.f32 %v707_v47, %v706_v16  ;;  %v718_v10 = vmul.f32 %v717_v62, %v714_v3  ;;  %v2474_v40 = vld [vmem:[#allocation4 + $0x1d] sm:$0xff]  ;;  %v795_v13 = vstv %s2463_s6  ;;  %s2630_s6 = sld [smem:[#allocation9 + $0x45]] }
 0x1e6   : > { %1027 = vrot.lane.b32.xlu1 %v2379_v20, %s1725_s28  ;;  %1043 = vrot.lane.b32.xlu0 %v2423_v21, %s1720_s20 }
 0x1e7   : > { %v711_v51 = vadd.f32 %v709_v2, %v701_v17  ;;  %v720_v23 = vadd.f32 %v718_v10, %v710_v14  ;;  %v2481_v10 = vld [vmem:[#allocation4 + $0x25] sm:$0xff] }
 0x1e8   : > { %v716_v24 = vpop.permute.xlu1 %715  ;;  %v724_v9 = vpop.permute.xlu0 %723 }
 0x1e9   : > { %v719_v25 = vmul.f32 %v717_v62, %v716_v24  ;;  %v728_v53 = vmul.f32 %v727_v22, %v724_v9 }
 0x1ea   : > { %1045 = vrot.lane.b32.xlu1 %v2432_v26, %s1720_s20  ;;  %1053 = vrot.lane.b32.xlu0 %v2423_v21, %s1721_s26 }
 0x1eb   : > { %v721_v28 = vadd.f32 %v719_v25, %v711_v51  ;;  %v730_v19 = vadd.f32 %v728_v53, %v720_v23 }
 0x1ec   : > { %v726_v30 = vpop.permute.xlu1 %725  ;;  %v734_v31 = vpop.permute.xlu0 %733 }
 0x1ed   : > { %v729_v32 = vmul.f32 %v727_v22, %v726_v30  ;;  %v738_v29 = vmul.f32 %v737_v27, %v734_v31  ;;  %v805_v22 = vstv %s2471_s7  ;;  %s2646_s7 = sld [smem:[#allocation9 + $0x46]] }
 0x1ee   : > { %1055 = vrot.lane.b32.xlu1 %v2432_v26, %s1721_s26  ;;  %1063 = vrot.lane.b32.xlu0 %v2423_v21, %s1722_s27 }
 0x1ef   : > { %v731_v59 = vadd.f32 %v729_v32, %v721_v28  ;;  %v740_v34 = vadd.f32 %v738_v29, %v730_v19 }
 0x1f0   : > { %v736_v48 = vpop.permute.xlu1 %735  ;;  %v744_v35 = vpop.permute.xlu0 %743 }
 0x1f1   : > { %v739_v36 = vmul.f32 %v737_v27, %v736_v48  ;;  %v748_v37 = vmul.f32 %v747_v33, %v744_v35 }
 0x1f2   : > { %1065 = vrot.lane.b32.xlu1 %v2432_v26, %s1722_s27  ;;  %1073 = vrot.lane.b32.xlu0 %v2423_v21, %s1723_s19 }
 0x1f3   : > { %v741_v39 = vadd.f32 %v739_v36, %v731_v59  ;;  %v750_v42 = vadd.f32 %v748_v37, %v740_v34  ;;  %v2506_v36 = vld [vmem:[#allocation4 + $0x1e] sm:$0xff] }
 0x1f4   : > { %v746_v46 = vpop.permute.xlu1 %745  ;;  %v754_v43 = vpop.permute.xlu0 %753 }
 0x1f5   : > { %v749_v49 = vmul.f32 %v747_v33, %v746_v46  ;;  %v758_v52 = vmul.f32 %v757_v38, %v754_v43 }
 0x1f6   : > { %1075 = vrot.lane.b32.xlu1 %v2432_v26, %s1723_s19  ;;  %1083 = vrot.lane.b32.xlu0 %v2423_v21, %s1724_s24 }
 0x1f7   : > { %v751_v55 = vadd.f32 %v749_v49, %v741_v39  ;;  %v760_v44 = vadd.f32 %v758_v52, %v750_v42  ;;  %v2514_v39 = vld [vmem:[#allocation4 + $0x26] sm:$0xff] }
 0x1f8   : > { %v756_v41 = vpop.permute.xlu1 %755  ;;  %v772_v0 = vpop.permute.xlu0 %771 }
 0x1f9   : > { %v768_v47 = vadd.f32 %v766_v56, %v760_v44  ;;  %v759_v58 = vmul.f32 %v757_v38, %v756_v41  ;;  %v776_v4 = vmul.f32 %v775_v54, %v772_v0  ;;  %v815_v56 = vstv %s1433_s18  ;;  %s2651_s18 = sld [smem:[#allocation9 + $0x47]] }
 0x1fa   : > { %1085 = vrot.lane.b32.xlu1 %v2432_v26, %s1724_s24  ;;  %1093 = vrot.lane.b32.xlu0 %v2423_v21, %s1725_s28 }
 0x1fb   : > { %v761_v7 = vadd.f32 %v759_v58, %v751_v55  ;;  %v778_v63 = vadd.f32 %v776_v4, %v768_v47 }
 0x1fc   : > { %v774_v57 = vpop.permute.xlu1 %773  ;;  %v782_v8 = vpop.permute.xlu0 %781 }
 0x1fd   : > { %v769_v45 = vadd.f32 %v767_v6, %v761_v7  ;;  %v777_v11 = vmul.f32 %v775_v54, %v774_v57  ;;  %v786_v62 = vmul.f32 %v785_v60, %v782_v8 }
 0x1fe   : > { %1095 = vrot.lane.b32.xlu1 %v2432_v26, %s1725_s28  ;;  %1111 = vrot.lane.b32.xlu0 %v2474_v40, %s1720_s20 }
 0x1ff   : > { %v779_v14 = vadd.f32 %v777_v11, %v769_v45  ;;  %v788_v16 = vadd.f32 %v786_v62, %v778_v63 }
 0x200   : > { %v784_v5 = vpop.permute.xlu1 %783  ;;  %v792_v3 = vpop.permute.xlu0 %791 }
 0x201   : > { %v787_v17 = vmul.f32 %v785_v60, %v784_v5  ;;  %v796_v2 = vmul.f32 %v795_v13, %v792_v3 }
 0x202   : > { %1113 = vrot.lane.b32.xlu1 %v2481_v10, %s1720_s20  ;;  %1121 = vrot.lane.b32.xlu0 %v2474_v40, %s1721_s26 }
 0x203   : > { %v789_v51 = vadd.f32 %v787_v17, %v779_v14  ;;  %v798_v23 = vadd.f32 %v796_v2, %v788_v16 }
 0x204   : > { %v794_v24 = vpop.permute.xlu1 %793  ;;  %v802_v9 = vpop.permute.xlu0 %801 }
 0x205   : > { %v797_v25 = vmul.f32 %v795_v13, %v794_v24  ;;  %v806_v53 = vmul.f32 %v805_v22, %v802_v9  ;;  %v873_v9 = vstv %s2571_s8  ;;  %s2681_s8 = sld [smem:[#allocation9 + $0x4d]] }
 0x206   : > { %1123 = vrot.lane.b32.xlu1 %v2481_v10, %s1721_s26  ;;  %1131 = vrot.lane.b32.xlu0 %v2474_v40, %s1722_s27 }
 0x207   : > { %v799_v27 = vadd.f32 %v797_v25, %v789_v51  ;;  %v808_v28 = vadd.f32 %v806_v53, %v798_v23 }
 0x208   : > { %v804_v19 = vpop.permute.xlu1 %803  ;;  %v812_v30 = vpop.permute.xlu0 %811 }
 0x209   : > { %v807_v31 = vmul.f32 %v805_v22, %v804_v19  ;;  %v816_v47 = vmul.f32 %v815_v56, %v812_v30 }
 0x20a   : > { %1133 = vrot.lane.b32.xlu1 %v2481_v10, %s1722_s27  ;;  %1141 = vrot.lane.b32.xlu0 %v2474_v40, %s1723_s19 }
 0x20b   : > { %v809_v32 = vadd.f32 %v807_v31, %v799_v27  ;;  %v818_v6 = vadd.f32 %v816_v47, %v808_v28  ;;  %v883_v28 = vstv %s2574_s17  ;;  %s2685_s17 = sld [smem:[#allocation9 + $0x4e]] }
 0x20c   : > { %v814_v29 = vpop.permute.xlu1 %813  ;;  %v822_v33 = vpop.permute.xlu0 %821 }
 0x20d   : > { %v817_v7 = vmul.f32 %v815_v56, %v814_v29 }
 0x20e   : > { %1143 = vrot.lane.b32.xlu1 %v2481_v10, %s1723_s19  ;;  %1151 = vrot.lane.b32.xlu0 %v2474_v40, %s1724_s24 }
 0x20f   : > { %v819_v13 = vadd.f32 %v817_v7, %v809_v32 }
 0x210   : > { %v824_v59 = vpop.permute.xlu1 %823  ;;  %v840_v34 = vpop.permute.xlu0 %839 }
 0x212   : > { %1153 = vrot.lane.b32.xlu1 %v2481_v10, %s1724_s24  ;;  %1161 = vrot.lane.b32.xlu0 %v2474_v40, %s1725_s28 }
 0x214   : > { %v2504_v48 = vpop.permute.xlu1 %841  ;;  %v850_v35 = vpop.permute.xlu0 %849 }
 0x216   : > { %1163 = vrot.lane.b32.xlu1 %v2481_v10, %s1725_s28  ;;  %1179 = vrot.lane.b32.xlu0 %v2506_v36, %s1720_s20 }
 0x218   : > { %v2512_v37 = vpop.permute.xlu1 %851  ;;  %v860_v38 = vpop.permute.xlu0 %859 }
 0x21a   : > { %1181 = vrot.lane.b32.xlu1 %v2514_v39, %s1720_s20  ;;  %1189 = vrot.lane.b32.xlu0 %v2506_v36, %s1721_s26  ;;  %s1434_s20 = sld [smem:[#allocation9 + $0x37]] }
 0x21c   : > { %v2520_v42 = vpop.permute.xlu1 %861  ;;  %v2522_v46 = vpop.permute.xlu0 %869 }
 0x21d   : > { %v874_v29 = vmul.f32 %v873_v9, %v2522_v46 }
 0x21e   : > { %1191 = vrot.lane.b32.xlu1 %v2514_v39, %s1721_s26  ;;  %1199 = vrot.lane.b32.xlu0 %v2506_v36, %s1722_s27  ;;  %s2548_s26 = sld [smem:[#allocation9 + $0x38]] }
 0x220   : > { %v2528_v50 = vpop.permute.xlu1 %871  ;;  %v2530_v43 = vpop.permute.xlu0 %879  ;;  %v825_v44 = vstv %s1434_s20  ;;  %s2655_s20 = sld [smem:[#allocation9 + $0x48]] }
 0x221   : > { %v826_v58 = vmul.f32 %v825_v44, %v822_v33  ;;  %v827_v8 = vmul.f32 %v825_v44, %v824_v59  ;;  %v875_v46 = vmul.f32 %v873_v9, %v2528_v50 }
 0x222   : > { %1201 = vrot.lane.b32.xlu1 %v2514_v39, %s1722_s27  ;;  %1209 = vrot.lane.b32.xlu0 %v2506_v36, %s1723_s19  ;;  %s2554_s27 = sld [smem:[#allocation9 + $0x39]] }
 0x223   : > { %v828_v57 = vadd.f32 %v826_v58, %v818_v6  ;;  %v829_v3 = vadd.f32 %v827_v8, %v819_v13  ;;  %v901_v58 = vstv %s2593_s3  ;;  %s2690_s3 = sld [smem:[#allocation9 + $0x50]] }
 0x224   : > { %v2536_v49 = vpop.permute.xlu1 %881  ;;  %v2538_v52 = vpop.permute.xlu0 %889  ;;  %v833_v63 = vstv %s2548_s26  ;;  %s2659_s26 = sld [smem:[#allocation9 + $0x49]] }
 0x225   : > { %v834_v14 = vmul.f32 %v833_v63, %v2238_v1  ;;  %v835_v23 = vmul.f32 %v833_v63, %v2254_v15 }
 0x226   : > { %1211 = vrot.lane.b32.xlu1 %v2514_v39, %s1723_s19  ;;  %1219 = vrot.lane.b32.xlu0 %v2506_v36, %s1724_s24  ;;  %s2560_s19 = sld [smem:[#allocation9 + $0x3a]] }
 0x227   : > { %v836_v5 = vadd.f32 %v834_v14, %v828_v57  ;;  %v837_v25 = vadd.f32 %v835_v23, %v829_v3  ;;  %v941_v23 = vstv %s2618_s30  ;;  %s2706_s30 = sld [smem:[#allocation9 + $0x54]] }
 0x228   : > { %v2544_v54 = vpop.permute.xlu1 %891  ;;  %v2546_v55 = vpop.permute.xlu0 %907  ;;  %v843_v45 = vstv %s2554_s27  ;;  %s2663_s27 = sld [smem:[#allocation9 + $0x4a]] }
 0x229   : > { %v844_v17 = vmul.f32 %v843_v45, %v840_v34  ;;  %v845_v1 = vmul.f32 %v843_v45, %v2504_v48  ;;  %v884_v48 = vmul.f32 %v883_v28, %v2530_v43  ;;  %v885_v43 = vmul.f32 %v883_v28, %v2536_v49 }
 0x22a   : > { %1221 = vrot.lane.b32.xlu1 %v2514_v39, %s1724_s24  ;;  %1229 = vrot.lane.b32.xlu0 %v2506_v36, %s1725_s28  ;;  %s2564_s24 = sld [smem:[#allocation9 + $0x3b]]  ;;  %v902_v45 = vmul.f32 %v901_v58, %v2310_v12  ;;  %v921_v49 = vstv %s2606_s16  ;;  %s2696_s16 = sld [smem:[#allocation9 + $0x52]] }
 0x22b   : > { %v846_v53 = vadd.f32 %v844_v17, %v836_v5  ;;  %v847_v33 = vadd.f32 %v845_v1, %v837_v25  ;;  %v903_v17 = vmul.f32 %v901_v58, %v2320_v18 }
 0x22c   : > { %v2556_v41 = vpop.permute.xlu1 %909  ;;  %v2558_v0 = vpop.permute.xlu0 %917  ;;  %v853_v16 = vstv %s2560_s19  ;;  %s2667_s19 = sld [smem:[#allocation9 + $0x4b]] }
 0x22d   : > { %v854_v24 = vmul.f32 %v853_v16, %v850_v35  ;;  %v855_v32 = vmul.f32 %v853_v16, %v2512_v37 }
 0x22e   : > { %1231 = vrot.lane.b32.xlu1 %v2514_v39, %s1725_s28  ;;  %s2582_s28 = sld [smem:[#allocation9 + $0x3e]] }
 0x22f   : > { %v856_v31 = vadd.f32 %v854_v24, %v846_v53  ;;  %v857_v37 = vadd.f32 %v855_v32, %v847_v33 }
 0x230   : > { %v2566_v4 = vpop.permute.xlu1 %919  ;;  %v2568_v60 = vpop.permute.xlu0 %927  ;;  %v863_v2 = vstv %s2564_s24  ;;  %s2671_s24 = sld [smem:[#allocation9 + $0x4c]] }
 0x231   : > { %v864_v27 = vmul.f32 %v863_v2, %v860_v38  ;;  %v865_v34 = vmul.f32 %v863_v2, %v2520_v42  ;;  %v922_v2 = vmul.f32 %v921_v49, %v2558_v0  ;;  %v923_v28 = vmul.f32 %v921_v49, %v2566_v4 }
 0x233   : > { %v866_v59 = vadd.f32 %v864_v27, %v856_v31  ;;  %v867_v47 = vadd.f32 %v865_v34, %v857_v37  ;;  %v951_v27 = vstv %s2626_s5  ;;  %v961_v31 = vstv %s2630_s6  ;;  %s2709_s5 = sld [smem:[#allocation9 + $0x55]]  ;;  %s2711_s6 = sld [smem:[#allocation9 + $0x56]] }
 0x234   : > { %v2576_v11 = vpop.permute.xlu1 %929  ;;  %v2578_v62 = vpop.permute.xlu0 %937  ;;  %v893_v15 = vstv %s2582_s28  ;;  %s2688_s28 = sld [smem:[#allocation9 + $0x4f]] }
 0x235   : > { %v876_v56 = vadd.f32 %v874_v29, %v866_v59  ;;  %v894_v44 = vmul.f32 %v893_v15, %v2538_v52  ;;  %v877_v63 = vadd.f32 %v875_v46, %v867_v47  ;;  %v895_v50 = vmul.f32 %v893_v15, %v2544_v54 }
 0x236   : > { %v911_v52 = vstv %s2602_s15  ;;  %v931_v54 = vstv %s2614_s23  ;;  %v942_v18 = vmul.f32 %v941_v23, %v2578_v62  ;;  %v969_v46 = vstv %s2646_s7  ;;  %s2693_s15 = sld [smem:[#allocation9 + $0x51]]  ;;  %s2700_s23 = sld [smem:[#allocation9 + $0x53]] }
 0x237   : > { %v886_v42 = vadd.f32 %v884_v48, %v876_v56  ;;  %v887_v8 = vadd.f32 %v885_v43, %v877_v63  ;;  %v912_v3 = vmul.f32 %v911_v52, %v2546_v55  ;;  %v913_v53 = vmul.f32 %v911_v52, %v2556_v41  ;;  %s2713_s7 = sld [smem:[#allocation9 + $0x57]] }
 0x238   : > { %v2585_v22 = vpop.permute.xlu1 %939  ;;  %v2587_v51 = vpop.permute.xlu0 %947  ;;  %v932_v1 = vmul.f32 %v931_v54, %v2568_v60  ;;  %v933_v41 = vmul.f32 %v931_v54, %v2576_v11  ;;  %v970_v58 = vmul.f32 %v969_v46, %v2368_v61  ;;  %v989_v63 = vstv %s2655_s20  ;;  %s2719_s20 = sld [smem:[#allocation9 + $0x59]] }
 0x239   : > { %v896_v57 = vadd.f32 %v894_v44, %v886_v42  ;;  %v897_v5 = vadd.f32 %v895_v50, %v887_v8  ;;  %v952_v60 = vmul.f32 %v951_v27, %v2587_v51  ;;  %v943_v4 = vmul.f32 %v941_v23, %v2585_v22 }
 0x23a   : > { %v979_v22 = vstv %s2651_s18  ;;  %v999_v52 = vstv %s2659_s26  ;;  %s2716_s18 = sld [smem:[#allocation9 + $0x58]]  ;;  %s2723_s26 = sld [smem:[#allocation9 + $0x5a]] }
 0x23b   : > { %v904_v16 = vadd.f32 %v902_v45, %v896_v57  ;;  %v905_v9 = vadd.f32 %v903_v17, %v897_v5  ;;  %v971_v45 = vmul.f32 %v969_v46, %v2379_v20  ;;  %v1019_v17 = vstv %s2667_s19  ;;  %s2732_s19 = sld [smem:[#allocation9 + $0x5c]] }
 0x23c   : > { %v2595_v19 = vpop.permute.xlu1 %949  ;;  %v2597_v30 = vpop.permute.xlu0 %957  ;;  %v1067_v46 = vstv %s2690_s3  ;;  %s2747_s3 = sld [smem:[#allocation9 + $0x61]] }
 0x23d   : > { %v914_v25 = vadd.f32 %v912_v3, %v904_v16  ;;  %v915_v29 = vadd.f32 %v913_v53, %v905_v9  ;;  %v962_v62 = vmul.f32 %v961_v31, %v2597_v30  ;;  %v953_v11 = vmul.f32 %v951_v27, %v2595_v19 }
 0x23e   : > { %v1009_v16 = vstv %s2663_s27  ;;  %v1029_v53 = vstv %s2671_s24  ;;  %s2729_s27 = sld [smem:[#allocation9 + $0x5b]]  ;;  %s2734_s24 = sld [smem:[#allocation9 + $0x5d]] }
 0x23f   : > { %v924_v55 = vadd.f32 %v922_v2, %v914_v25  ;;  %v925_v33 = vadd.f32 %v923_v28, %v915_v29 }
 0x240   : > { %v2608_v35 = vpop.permute.xlu1 %959  ;;  %v2610_v38 = vpop.permute.xlu0 %975 }
 0x241   : > { %v934_v15 = vadd.f32 %v932_v1, %v924_v55  ;;  %v935_v37 = vadd.f32 %v933_v41, %v925_v33  ;;  %v963_v47 = vmul.f32 %v961_v31, %v2608_v35  ;;  %v980_v50 = vmul.f32 %v979_v22, %v2610_v38 }
 0x243   : > { %v944_v59 = vadd.f32 %v942_v18, %v934_v15  ;;  %v945_v51 = vadd.f32 %v943_v4, %v935_v37  ;;  %v1037_v15 = vstv %s2681_s8  ;;  %s2736_s8 = sld [smem:[#allocation9 + $0x5e]] }
 0x244   : > { %v2620_v6 = vpop.permute.xlu1 %977  ;;  %v2622_v7 = vpop.permute.xlu0 %985  ;;  %v1038_v4 = vmul.f32 %v1037_v15, %v2423_v21 }
 0x245   : > { %v954_v56 = vadd.f32 %v952_v60, %v944_v59  ;;  %v955_v43 = vadd.f32 %v953_v11, %v945_v51  ;;  %v990_v49 = vmul.f32 %v989_v63, %v2622_v7  ;;  %v981_v61 = vmul.f32 %v979_v22, %v2620_v6 }
 0x246   : > { %v1047_v59 = vstv %s2685_s17  ;;  %v1039_v51 = vmul.f32 %v1037_v15, %v2432_v26  ;;  %s2739_s17 = sld [smem:[#allocation9 + $0x5f]] }
 0x247   : > { %v964_v44 = vadd.f32 %v962_v62, %v954_v56  ;;  %v965_v19 = vadd.f32 %v963_v47, %v955_v43  ;;  %v1057_v62 = vstv %s2688_s28  ;;  %v1077_v47 = vstv %s2693_s15  ;;  %s2742_s28 = sld [smem:[#allocation9 + $0x60]]  ;;  %s1373_s15 = sshll.u32 %s1889_s4, 4 }
 0x248   : > { %v2632_v13 = vpop.permute.xlu1 %987  ;;  %v2634_v14 = vpop.permute.xlu0 %995 }
 0x249   : > { %v972_v57 = vadd.f32 %v970_v58, %v964_v44  ;;  %v973_v3 = vadd.f32 %v971_v45, %v965_v19  ;;  %v1000_v54 = vmul.f32 %v999_v52, %v2634_v14  ;;  %v991_v9 = vmul.f32 %v989_v63, %v2632_v13 }
 0x24a   : > { %v1087_v19 = vstv %s2696_s16  ;;  %v1097_v45 = vstv %s2700_s23  ;;  %s1485_s16 = sshll.u32 %s1703_s12, 8  ;;  %s192_s23 = scalar_lea.vmem [#allocation10], %s1373_s15 }
 0x24b   : > { %v982_v5 = vadd.f32 %v980_v50, %v972_v57  ;;  %v983_v20 = vadd.f32 %v981_v61, %v973_v3 }
 0x24c   : > { %v2641_v12 = vpop.permute.xlu1 %997  ;;  %v1006_v24 = vpop.permute.xlu0 %1005 }
 0x24d   : > { %v992_v23 = vadd.f32 %v990_v49, %v982_v5  ;;  %v1010_v25 = vmul.f32 %v1009_v16, %v1006_v24  ;;  %v1001_v1 = vmul.f32 %v999_v52, %v2641_v12  ;;  %v993_v55 = vadd.f32 %v991_v9, %v983_v20 }
 0x24f   : > { %v1002_v7 = vadd.f32 %v1000_v54, %v992_v23  ;;  %v1003_v13 = vadd.f32 %v1001_v1, %v993_v55  ;;  %v1115_v1 = vstv %s2709_s5 }
 0x250   : > { %v1008_v0 = vpop.permute.xlu1 %1007  ;;  %v1016_v32 = vpop.permute.xlu0 %1015 }
 0x251   : > { %v1020_v6 = vmul.f32 %v1019_v17, %v1016_v32  ;;  %v1012_v28 = vadd.f32 %v1010_v25, %v1002_v7  ;;  %v1011_v18 = vmul.f32 %v1009_v16, %v1008_v0  ;;  %v1105_v25 = vstv %s2706_s30  ;;  %s1266_s30 = sshll.u32 %s192_s23, 4  ;;  %s2761_s30 = int_to_ptr.vmem [resolvable:$true] %s1266_s30 }
 0x252   : > { %v1106_v55 = vmul.f32 %v1105_v25, %v2474_v40  ;;  %v1155_v40 = vstv %s2719_s20  ;;  %s1625_s12 = scalar_lea.vmem %s2761_s30, 256  ;;  %s1726_s20 = smov [#allocation10]  }
 0x253   : > { %v1022_v24 = vadd.f32 %v1020_v6, %v1012_v28  ;;  %v1013_v41 = vadd.f32 %v1011_v18, %v1003_v13  ;;  %v1125_v28 = vstv %s2711_s6  ;;  %p1626_p12 = scmp.ne.s32.totalorder %s2761_s30, %s1625_s12 }
 0x254   : > { %v1018_v34 = vpop.permute.xlu1 %1017  ;;  %v1026_v48 = vpop.permute.xlu0 %1025 }
 0x255   : > { %v1030_v31 = vmul.f32 %v1029_v53, %v1026_v48  ;;  %v1021_v29 = vmul.f32 %v1019_v17, %v1018_v34  ;;  %p1627_p13 = pnand %p1626_p12, %p2829_p2 }
 0x257   : > { %v1032_v60 = vadd.f32 %v1030_v31, %v1022_v24  ;;  %v1023_v0 = vadd.f32 %v1021_v29, %v1013_v41  ;;  %v1135_v24 = vstv %s2713_s7  ;;  %v1145_v41 = vstv %s2716_s18  ;;  %s2759_s7 = scalar_lea.hbm %s2813_s2, %s1485_s16  ;;  %s1253_s18 = scalar_lea.sflag [#allocation7], %s1889_s4 }
 0x258   : > { %v1028_v30 = vpop.permute.xlu1 %1027  ;;  %v1044_v42 = vpop.permute.xlu0 %1043  ;;  %p1628_p6 = pneg %p1627_p13 }
 0x259   : > { %v1031_v33 = vmul.f32 %v1029_v53, %v1028_v30  ;;  %v1040_v56 = vadd.f32 %v1038_v4, %v1032_v60  ;;  %v1048_v11 = vmul.f32 %v1047_v59, %v1044_v42 }
 0x25b   : > { %v1033_v37 = vadd.f32 %v1031_v33, %v1023_v0  ;;  %v1050_v43 = vadd.f32 %v1048_v11, %v1040_v56  ;;  %v1165_v56 = vstv %s2723_s26  ;;  %s1629_s26 = sshll.u32 %s1726_s20, 4  ;;  %s1630_s26 = int_to_ptr.vmem [resolvable:$false] %s1629_s26 }
 0x25c   : > { %v1046_v8 = vpop.permute.xlu1 %1045  ;;  %v1054_v35 = vpop.permute.xlu0 %1053  ;;  %p1632_p0 = scmp.lt.s32.totalorder %s2761_s30, %s1630_s26 }
 0x25d   : > { %v1058_v44 = vmul.f32 %v1057_v62, %v1054_v35  ;;  %v1041_v58 = vadd.f32 %v1039_v51, %v1033_v37  ;;  %v1049_v21 = vmul.f32 %v1047_v59, %v1046_v8 }
 0x25f   : > { %v1060_v57 = vadd.f32 %v1058_v44, %v1050_v43  ;;  %v1051_v26 = vadd.f32 %v1049_v21, %v1041_v58 }
 0x260   : > { %v1056_v2 = vpop.permute.xlu1 %1055  ;;  %v1064_v38 = vpop.permute.xlu0 %1063 }
 0x261   : > { %v1068_v63 = vmul.f32 %v1067_v46, %v1064_v38  ;;  %v1059_v50 = vmul.f32 %v1057_v62, %v1056_v2 }
 0x263   : > { %v1070_v35 = vadd.f32 %v1068_v63, %v1060_v57  ;;  %v1061_v8 = vadd.f32 %v1059_v50, %v1051_v26  ;;  %v1173_v57 = vstv %s2729_s27  ;;  %v1183_v26 = vstv %s2732_s19  ;;  %s1631_s27 = scalar_lea.vmem %s1630_s26, 512 }
 0x264   : > { %v1066_v14 = vpop.permute.xlu1 %1065  ;;  %v1074_v27 = vpop.permute.xlu0 %1073  ;;  %p1633_p1 = scmp.lt.s32.totalorder %s1631_s27, %s1625_s12 }
 0x265   : > { %v1078_v52 = vmul.f32 %v1077_v47, %v1074_v27  ;;  %v1069_v16 = vmul.f32 %v1067_v46, %v1066_v14 }
 0x266   : > { %p1634_p9 = por %p1633_p1, %p1632_p0 }
 0x267   : > { %v1080_v3 = vadd.f32 %v1078_v52, %v1070_v35  ;;  %v1071_v38 = vadd.f32 %v1069_v16, %v1061_v8  ;;  %v1174_v16 = vmul.f32 %v1173_v57, %v2506_v36 }
 0x268   : > { %v1076_v12 = vpop.permute.xlu1 %1075  ;;  %v1084_v32 = vpop.permute.xlu0 %1083  ;;  %p1635_p8 = pnand %p1634_p9, %p1628_p6 }
 0x269   : > { %v1088_v5 = vmul.f32 %v1087_v19, %v1084_v32  ;;  %v1079_v61 = vmul.f32 %v1077_v47, %v1076_v12  ;;  %v1107_v12 = vmul.f32 %v1105_v25, %v2481_v10  ;;  %v1213_v25 = vstv %s2739_s17 }
 0x26b   : > { %v1090_v23 = vadd.f32 %v1088_v5, %v1080_v3  ;;  %v1081_v53 = vadd.f32 %v1079_v61, %v1071_v38  ;;  %v1193_v5 = vstv %s2734_s24  ;;  %v1175_v38 = vmul.f32 %v1173_v57, %v2514_v39 }
 0x26c   : > { %v1086_v48 = vpop.permute.xlu1 %1085  ;;  %v1094_v34 = vpop.permute.xlu0 %1093  ;;  %v1233_v39 = vstv %s2747_s3 }
 0x26d   : > { %v1098_v54 = vmul.f32 %v1097_v45, %v1094_v34  ;;  %v1089_v9 = vmul.f32 %v1087_v19, %v1086_v48 }
 0x26f   : > { %v1100_v20 = vadd.f32 %v1098_v54, %v1090_v23  ;;  %v1091_v27 = vadd.f32 %v1089_v9, %v1081_v53 }
 0x270   : > { %v1096_v22 = vpop.permute.xlu1 %1095  ;;  %v1112_v30 = vpop.permute.xlu0 %1111 }
 0x271   : > { %v1099_v7 = vmul.f32 %v1097_v45, %v1096_v22  ;;  %v1108_v31 = vadd.f32 %v1106_v55, %v1100_v20  ;;  %v1116_v13 = vmul.f32 %v1115_v1, %v1112_v30 }
 0x273   : > { %v1101_v18 = vadd.f32 %v1099_v7, %v1091_v27  ;;  %v1118_v60 = vadd.f32 %v1116_v13, %v1108_v31 }
 0x274   : > { %v1114_v42 = vpop.permute.xlu1 %1113  ;;  %v1122_v49 = vpop.permute.xlu0 %1121 }
 0x275   : > { %v1126_v32 = vmul.f32 %v1125_v28, %v1122_v49  ;;  %v1109_v33 = vadd.f32 %v1107_v12, %v1101_v18  ;;  %v1117_v59 = vmul.f32 %v1115_v1, %v1114_v42 }
 0x277   : > { %v1128_v48 = vadd.f32 %v1126_v32, %v1118_v60  ;;  %v1119_v11 = vadd.f32 %v1117_v59, %v1109_v33 }
 0x278   : > { %v1124_v17 = vpop.permute.xlu1 %1123  ;;  %v1132_v2 = vpop.permute.xlu0 %1131 }
 0x279   : > { %v1136_v0 = vmul.f32 %v1135_v24, %v1132_v2  ;;  %v1127_v34 = vmul.f32 %v1125_v28, %v1124_v17  ;;  %v1203_v2 = vstv %s2736_s8 }
 0x27b   : > { %v1138_v10 = vadd.f32 %v1136_v0, %v1128_v48  ;;  %v1129_v22 = vadd.f32 %v1127_v34, %v1119_v11 }
 0x27c   : > { %v1134_v6 = vpop.permute.xlu1 %1133  ;;  %v1142_v14 = vpop.permute.xlu0 %1141 }
 0x27d   : > { %v1146_v37 = vmul.f32 %v1145_v41, %v1142_v14  ;;  %v1137_v46 = vmul.f32 %v1135_v24, %v1134_v6  ;;  %v1223_v6 = vstv %s2742_s28 }
 0x27f   : > { %v1148_v30 = vadd.f32 %v1146_v37, %v1138_v10  ;;  %v1139_v21 = vadd.f32 %v1137_v46, %v1129_v22 }
 0x280   : > { %v1144_v29 = vpop.permute.xlu1 %1143  ;;  %v1152_v15 = vpop.permute.xlu0 %1151 }
 0x281   : > { %v1156_v51 = vmul.f32 %v1155_v40, %v1152_v15  ;;  %v1147_v43 = vmul.f32 %v1145_v41, %v1144_v29 }
 0x283   : > { %v1158_v63 = vadd.f32 %v1156_v51, %v1148_v30  ;;  %v1149_v45 = vadd.f32 %v1147_v43, %v1139_v21 }
 0x284   : > { %v1154_v4 = vpop.permute.xlu1 %1153  ;;  %v1162_v62 = vpop.permute.xlu0 %1161 }
 0x285   : > { %v1166_v58 = vmul.f32 %v1165_v56, %v1162_v62  ;;  %v1157_v19 = vmul.f32 %v1155_v40, %v1154_v4 }
 0x287   : > { %v1168_v42 = vadd.f32 %v1166_v58, %v1158_v63  ;;  %v1159_v35 = vadd.f32 %v1157_v19, %v1149_v45 }
 0x288   : > { %v1164_v44 = vpop.permute.xlu1 %1163  ;;  %v1180_v47 = vpop.permute.xlu0 %1179 }
 0x289   : > { %v1167_v49 = vmul.f32 %v1165_v56, %v1164_v44  ;;  %v1176_v54 = vadd.f32 %v1174_v16, %v1168_v42  ;;  %v1184_v17 = vmul.f32 %v1183_v26, %v1180_v47 }
 0x28b   : > { %v1169_v61 = vadd.f32 %v1167_v49, %v1159_v35  ;;  %v1186_v20 = vadd.f32 %v1184_v17, %v1176_v54 }
 0x28c   : > { %v1182_v50 = vpop.permute.xlu1 %1181  ;;  %v1190_v52 = vpop.permute.xlu0 %1189 }
 0x28d   : > { %v1194_v23 = vmul.f32 %v1193_v5, %v1190_v52  ;;  %v1177_v7 = vadd.f32 %v1175_v38, %v1169_v61  ;;  %v1185_v36 = vmul.f32 %v1183_v26, %v1182_v50 }
 0x28f   : > { %v1196_v14 = vadd.f32 %v1194_v23, %v1186_v20  ;;  %v1187_v31 = vadd.f32 %v1185_v36, %v1177_v7 }
 0x290   : > { %v1192_v8 = vpop.permute.xlu1 %1191  ;;  %v1200_v3 = vpop.permute.xlu0 %1199 }
 0x291   : > { %v1204_v1 = vmul.f32 %v1203_v2, %v1200_v3  ;;  %v1195_v27 = vmul.f32 %v1193_v5, %v1192_v8 }
 0x293   : > { %v1206_v13 = vadd.f32 %v1204_v1, %v1196_v14  ;;  %v1197_v15 = vadd.f32 %v1195_v27, %v1187_v31 }
 0x294   : > { %v1202_v9 = vpop.permute.xlu1 %1201  ;;  %v1210_v53 = vpop.permute.xlu0 %1209 }
 0x295   : > { %v1214_v55 = vmul.f32 %v1213_v25, %v1210_v53  ;;  %v1205_v24 = vmul.f32 %v1203_v2, %v1202_v9 }
 0x297   : > { %v1216_v12 = vadd.f32 %v1214_v55, %v1206_v13  ;;  %v1207_v33 = vadd.f32 %v1205_v24, %v1197_v15 }
 0x298   : > { %v1212_v28 = vpop.permute.xlu1 %1211  ;;  %v1220_v18 = vpop.permute.xlu0 %1219 }
 0x299   : > { %v1224_v29 = vmul.f32 %v1223_v6, %v1220_v18  ;;  %v1215_v32 = vmul.f32 %v1213_v25, %v1212_v28 }
 0x29b   : > { %v1226_v59 = vadd.f32 %v1224_v29, %v1216_v12  ;;  %v1217_v4 = vadd.f32 %v1215_v32, %v1207_v33 }
 0x29c   : > { %v1222_v41 = vpop.permute.xlu1 %1221  ;;  %v1230_v60 = vpop.permute.xlu0 %1229 }
 0x29d   : > { %v1225_v0 = vmul.f32 %v1223_v6, %v1222_v41  ;;  %v1234_v40 = vmul.f32 %v1233_v39, %v1230_v60 }
 0x29f   : > { %v1236_v62 = vadd.f32 %v1234_v40, %v1226_v59  ;;  %v1227_v34 = vadd.f32 %v1225_v0, %v1217_v4 }
 0x2a0   : > { %v1232_v48 = vpop.permute.xlu1 %1231 }
 0x2a1   : > { %v1477_v37 = vmul.f32 -1.442695, %v1236_v62  ;;  %v1235_v56 = vmul.f32 %v1233_v39, %v1232_v48 }
 0x2a3   : > { %1572 = vpow2.f32 %v1477_v37  ;;  %v1237_v11 = vadd.f32 %v1235_v56, %v1227_v34 }
 0x2a5   : > { %v1478_v10 = vmul.f32 -1.442695, %v1237_v11 }
 0x2a7   : > { %1574 = vpow2.f32 %v1478_v10 }
 0x2ad   : > { %v1573_v46 = vpop.eup %1572 }
 0x2ae   : > { %v1244_v51 = vadd.f32 1.0, %v1573_v46 }
 0x2b0   : > { %1576 = vrcp.f32 %v1244_v51 }
 0x2b1   : > { %v1575_v44 = vpop.eup %1574 }
 0x2b2   : > { %v1245_v47 = vadd.f32 1.0, %v1575_v44 }
 0x2b4   : > { %1578 = vrcp.f32 %v1245_v47 }
 0x2ba   : > { %v1577_v22 = vpop.eup %1576 }
 0x2bb   : > { %1250 = vst.msk [vmem:[%s192_s23] sm:$0xff] %vm198_vm0, %v1577_v22 }
 0x2be   : > { %v1579_v30 = vpop.eup %1578 }
 0x2bf   : > { %1251 = vst.msk [vmem:[%s192_s23 + $0x8] sm:$0xff] %vm198_vm0, %v1579_v30 }
 0x2c0   : > { %1638 = shalt.err (!%p1635_p8)
}
 0x2c1   : > { %s1639_s19 = scalar_lea.hbm %s2759_s7, 256  ;;  %s1643_s17 = scalar_lea.hbm %s2813_s2, 512 }
 0x2c2   : > { %p1640_p4 = scmp.ne.s32.totalorder %s2759_s7, %s1639_s19  ;;  %p1644_p5 = scmp.lt.u32.totalorder %s2759_s7, %s2813_s2 }
 0x2c3   : > { %p1645_p3 = scmp.lt.u32.totalorder %s1643_s17, %s1639_s19  ;;  %p1647_p12 = scmp.lt.u32.totalorder %s1639_s19, %s2759_s7 }
 0x2c4   : > { %p1641_p10 = pnand %p1640_p4, %p2829_p2 }
 0x2c5   : > { %p1646_p7 = por %p1645_p3, %p1644_p5 }
 0x2c6   : > { %p1642_p11 = pneg %p1641_p10 }
 0x2c7   : > { %p1648_p13 = por %p1647_p12, %p1646_p7 }
 0x2c9   : > { %p1649_p6 = pnand %p1648_p13, %p1642_p11 }
 0x2cb   : > { %1652 = shalt.err (!%p1649_p6)
}
 0x2cc   : > { %s1727_s15 = smov 128   ;;  %s1728_s16 = smov 8  }
 0x2cd   : > { %1492 = dma.vmem_to_hbm [thread:$0]  (%p2829_p2), %s2761_s30, 256, %s2759_s7, %s1253_s18, %s1727_s15, %s1727_s15, %s1728_s16  }
 0x2ce PF: > { %s1281_s23 = sand.u32 1, %s1691_s9   ;;  %p2830_p0 = scmp.ne.s32.totalorder %s2822_s22, 0 }
 0x2cf   : > { %p2831_p1 = scmp.ge.s32.totalorder %s1711_s14, 2  ;;  %s1282_s5 = scalar_lea.sflag [#allocation7], %s1281_s23 }
 0x2d1   : > { %p1503_p9 = pnand %p2831_p1, %p2830_p0 }
 0x2d3   : > { %1686 = dma.done.wait (!%p1503_p9), %s1282_s5, 256  }
 0x2d4   : > { %1688 = vsyncadd (!%p1503_p9), %s1282_s5, 4294967040  ;;  %s19_s14 = sadd.s32 1, %s1711_s14   ;;  %s2832_s9 = smov %s1695_s10 }
 0x2d5   : > { %p16_p8 = scmp.ge.s32.totalorder %s19_s14, 4   ;;  %s2833_s10 = smov %s1699_s11 }
 0x2d6   : > { %s2834_s11 = smov %s1854_s25  ;;  %s2835_s12 = smov %s1707_s13 }
 0x2d7   : > { %s2836_s13 = smov %s2838_s29  ;;  %18 = sbr.rel (!%p16_p8) target bundleno = 7 (0x7), region = 90 }
 0x2de   :  { %1287 = vsyncpa [#allocation6], 1 }
 0x2df   :  { %1289 = vsyncpa [#allocation6 + $0x1], 1 }
 0x2e0   :  { %1290 = vsyncpa [#allocation7], 1 }
 0x2e1   :  { %1292 = vsyncpa [#allocation7 + $0x1], 1 }
 0x2e2   :  { %1293 = vsyncpa [#allocation8], 1 }
 0x2e3   :  { %1295 = vsyncpa [#allocation8 + $0x1], 1 }

</bundles_post_ra>
